<compile_context>
chip_gen: v5e
topology: v5e:2x2
jax: 0.10.0
libtpu: 0.0.40
codegen_flags: <defaults>
</compile_context>

<pallas_src>
import functools

import jax
import jax.numpy as jnp
from jax import lax
from jax.experimental import pallas as pl
from jax.experimental.pallas import tpu as pltpu

Z_DIM = 32                       # args.z (synthetic)
H_DIM = 256
W_ELEMS = 16 * 3 * 3 * 3         # 432
OUT_DIM = W_ELEMS + 16           # 448
OUT_PAD = 512                    # lane-dense output width (448 -> 512), sliced in wrapper
BN_EPS = 1e-5


def _round_up(n, m):
    return ((n + m - 1) // m) * m


# --------------------------------------------------------------------------------------
# Single-pass kernel: whole batch resident in VMEM, one grid step, stats in-register.
# --------------------------------------------------------------------------------------
def _single_pass_kernel(x_ref, w1_ref, w2_ref, w3_ref, out_ref, *, batch):
    inv_b = 1.0 / float(batch)

    def bn_relu(h):
        m = jnp.sum(h, axis=0, keepdims=True) * inv_b
        v = jnp.sum(h * h, axis=0, keepdims=True) * inv_b - m * m
        return jnp.maximum((h - m) * lax.rsqrt(v + BN_EPS), 0.0)

    h = jnp.dot(x_ref[...].astype(w1_ref.dtype), w1_ref[...],
                preferred_element_type=jnp.float32)
    h = bn_relu(h)
    h = jnp.dot(h.astype(w2_ref.dtype), w2_ref[...],
                preferred_element_type=jnp.float32)
    h = bn_relu(h)
    out_ref[...] = jnp.dot(h.astype(w3_ref.dtype), w3_ref[...],
                           preferred_element_type=jnp.float32)


# --------------------------------------------------------------------------------------
# Tiled 3-phase kernel: exact full-batch BatchNorm with batch tiling.
#   phase 0: h1 = x@W1, stash, accumulate BN1 sum/sumsq
#   phase 1: BN1+relu (full-batch stats), h2 = @W2, stash (reusing the same buffer), BN2 stats
#   phase 2: BN2+relu, y = @W3, write lane-dense output tile
# --------------------------------------------------------------------------------------
def _tiled_kernel(x_ref, w1_ref, w2_ref, w3_ref, out_ref,
                  h_scr, s1, q1, s2, q2, ss,
                  *, batch, bm, masked):
    phase = pl.program_id(0)
    i = pl.program_id(1)
    inv_b = 1.0 / float(batch)   # static

    @pl.when(jnp.logical_and(phase == 0, i == 0))
    def _init_stats():
        s1[...] = jnp.zeros_like(s1)
        q1[...] = jnp.zeros_like(q1)
        s2[...] = jnp.zeros_like(s2)
        q2[...] = jnp.zeros_like(q2)

    def stat_mask(h):
        # Zero out zero-padded batch rows so the BN sums stay exact (divisor is the true batch).
        if not masked:
            return h
        row = i * bm + lax.broadcasted_iota(jnp.int32, h.shape, 0)
        return jnp.where(row < batch, h, 0.0)

    @pl.when(phase == 0)
    def _phase0():
        h = jnp.dot(x_ref[...].astype(w1_ref.dtype), w1_ref[...],
                    preferred_element_type=jnp.float32)
        h_scr[i] = h
        hm = stat_mask(h)
        s1[...] += jnp.sum(hm, axis=0, keepdims=True)
        q1[...] += jnp.sum(hm * hm, axis=0, keepdims=True)

    @pl.when(phase == 1)
    def _phase1():
        @pl.when(i == 0)
        def _():                                   # BN1 scale/shift, once per phase
            m = s1[...] * inv_b
            v = q1[...] * inv_b - m * m
            sc = lax.rsqrt(v + BN_EPS)
            ss[0:1, :] = sc
            ss[1:2, :] = -m * sc
        h = jnp.maximum(h_scr[i] * ss[0:1, :] + ss[1:2, :], 0.0)
        h2 = jnp.dot(h.astype(w2_ref.dtype), w2_ref[...],
                     preferred_element_type=jnp.float32)
        h_scr[i] = h2                              # reuse the single stash (h1 no longer needed)
        hm = stat_mask(h2)
        s2[...] += jnp.sum(hm, axis=0, keepdims=True)
        q2[...] += jnp.sum(hm * hm, axis=0, keepdims=True)

    @pl.when(phase == 2)
    def _phase2():
        @pl.when(i == 0)
        def _():                                   # BN2 scale/shift, once per phase
            m = s2[...] * inv_b
            v = q2[...] * inv_b - m * m
            sc = lax.rsqrt(v + BN_EPS)
            ss[0:1, :] = sc
            ss[1:2, :] = -m * sc
        h = jnp.maximum(h_scr[i] * ss[0:1, :] + ss[1:2, :], 0.0)
        out_ref[...] = jnp.dot(h.astype(w3_ref.dtype), w3_ref[...],
                               preferred_element_type=jnp.float32)


def generator_w1(x, noise_key, params, *, block_m=512, compute_dtype=jnp.bfloat16,
                 noise_std=0.01, single_pass_max_b=1024):
    """x: (B, z) f32; params: dict(w1=(z,256), w2=(256,256), w3=(256,448)) f32.

    Returns (w, b) with w: (B, 16, 3, 3, 3), b: (B, 16) -- training-mode BatchNorm over the
    batch, gamma=1 / beta=0 (the args.bias == False branch of the PyTorch module).
    """
    B, z = x.shape
    cd = compute_dtype

    # Input noise (torch: zeros_like(x).normal_(0, 0.01) + x) -- done in the wrapper so the
    # kernel runs identically on compiled TPU and in interpret mode.
    if noise_std != 0.0:
        x = x + noise_std * jax.random.normal(noise_key, x.shape, x.dtype)

    w1 = params["w1"].astype(cd)
    w2 = params["w2"].astype(cd)
    w3 = jnp.pad(params["w3"].astype(cd), ((0, 0), (0, OUT_PAD - OUT_DIM)))
    w_bytes = 2 * (z * H_DIM + H_DIM * H_DIM + H_DIM * OUT_PAD)   # bf16 weights

    if B <= single_pass_max_b:
        # -------- single-pass fast path: one grid step, everything VMEM-resident --------
        vmem = 4 * B * (z + OUT_PAD) + 2 * w_bytes + 3 * 4 * B * H_DIM + (8 << 20)
        vmem = int(min(max(vmem, 32 << 20), 128 << 20))
        y = pl.pallas_call(
            functools.partial(_single_pass_kernel, batch=B),
            out_shape=jax.ShapeDtypeStruct((B, OUT_PAD), jnp.float32),
            compiler_params=pltpu.CompilerParams(vmem_limit_bytes=vmem),
        )(x, w1, w2, w3)
        bp = B
    else:
        # -------- tiled 3-phase path: exact full-batch BN across batch tiles --------
        bm = max(8, (int(block_m) // 8) * 8)
        bm = min(bm, _round_up(B, 8))
        num_tiles = -(-B // bm)
        bp = num_tiles * bm
        masked = bp != B
        if masked:
            x = jnp.pad(x, ((0, bp - B), (0, 0)))   # pad AFTER noise -> padded rows exactly zero

        vmem = (num_tiles * bm * H_DIM * 4                 # single activation stash
                + 2 * bm * z * 4 + 2 * bm * OUT_PAD * 4    # streamed x / out tiles (x2 buffers)
                + 2 * w_bytes                              # resident weights (x2 buffers)
                + 6 * 8 * H_DIM * 4                        # stats + scale/shift scratch (padded)
                + (4 << 20))                               # margin
        vmem = int(min(max(vmem, 32 << 20), 128 << 20))

        kernel = functools.partial(_tiled_kernel, batch=B, bm=bm, masked=masked)
        y = pl.pallas_call(
            kernel,
            out_shape=jax.ShapeDtypeStruct((bp, OUT_PAD), jnp.float32),
            grid_spec=pltpu.PrefetchScalarGridSpec(
                num_scalar_prefetch=0,
                grid=(3, num_tiles),                       # (phase, batch tile); phase outermost
                in_specs=[
                    # x tiles only move during phase 0 (phase-gated index map -> no re-fetch).
                    pl.BlockSpec((bm, z), lambda p, i: (jnp.where(p == 0, i, 0), 0)),
                    pl.BlockSpec((z, H_DIM), lambda p, i: (0, 0)),        # W1 (resident)
                    pl.BlockSpec((H_DIM, H_DIM), lambda p, i: (0, 0)),    # W2 (resident)
                    pl.BlockSpec((H_DIM, OUT_PAD), lambda p, i: (0, 0)),  # W3 (resident)
                ],
                # Output tile index only advances in phase 2 -> no garbage writebacks earlier.
                out_specs=pl.BlockSpec((bm, OUT_PAD),
                                       lambda p, i: (jnp.where(p == 2, i, 0), 0)),
                scratch_shapes=[
                    pltpu.VMEM((num_tiles, bm, H_DIM), jnp.float32),  # activation stash (h1->h2)
                    pltpu.VMEM((1, H_DIM), jnp.float32),              # BN1 sum
                    pltpu.VMEM((1, H_DIM), jnp.float32),              # BN1 sumsq
                    pltpu.VMEM((1, H_DIM), jnp.float32),              # BN2 sum
                    pltpu.VMEM((1, H_DIM), jnp.float32),              # BN2 sumsq
                    pltpu.VMEM((2, H_DIM), jnp.float32),              # BN scale / shift
                ],
            ),
            # The batch axis carries a cross-tile BN-stat reduction in scratch -> "arbitrary".
            compiler_params=pltpu.CompilerParams(
                dimension_semantics=("arbitrary", "arbitrary"),
                vmem_limit_bytes=vmem),
        )(x, w1, w2, w3)
        y = y[:B]

    w = y[:, :W_ELEMS].reshape(B, 16, 3, 3, 3)
    b = y[:, W_ELEMS:OUT_DIM].reshape(B, 16)
    return w, b


def _reference_forward(x, params, compute_dtype=jnp.bfloat16):
    """Pure-JAX reference (noise disabled), mirroring the kernel math."""
    cd = compute_dtype

    def bn_relu(h):
        m = jnp.mean(h, axis=0, keepdims=True)
        v = jnp.mean(h * h, axis=0, keepdims=True) - m * m
        return jnp.maximum((h - m) * lax.rsqrt(v + BN_EPS), 0.0)

    h = jnp.dot(x.astype(cd), params["w1"].astype(cd), preferred_element_type=jnp.float32)
    h = bn_relu(h)
    h = jnp.dot(h.astype(cd), params["w2"].astype(cd), preferred_element_type=jnp.float32)
    h = bn_relu(h)
    y = jnp.dot(h.astype(cd), params["w3"].astype(cd), preferred_element_type=jnp.float32)
    return y[:, :W_ELEMS].reshape(-1, 16, 3, 3, 3), y[:, W_ELEMS:OUT_DIM].reshape(-1, 16)


def init_params(key, z=Z_DIM):
    k1, k2, k3 = jax.random.split(key, 3)
    # Linear weights stored pre-transposed as (in_features, out_features); no linear biases
    # (args.bias == False).  BN affine is identity (gamma=1, beta=0) and therefore omitted.
    w1 = jax.random.uniform(k1, (z, H_DIM), jnp.float32, -1.0, 1.0) / jnp.sqrt(z)
    w2 = jax.random.uniform(k2, (H_DIM, H_DIM), jnp.float32, -1.0, 1.0) / jnp.sqrt(H_DIM)
    w3 = jax.random.uniform(k3, (H_DIM, OUT_DIM), jnp.float32, -1.0, 1.0) / jnp.sqrt(H_DIM)
    return dict(w1=w1, w2=w2, w3=w3)


if __name__ == "__main__":
    key = jax.random.PRNGKey(0)
    kp, kx, kn = jax.random.split(key, 3)

    B = 64                       # small batch of latent codes
    params = init_params(kp, Z_DIM)
    x = jax.random.normal(kx, (B, Z_DIM), jnp.float32)

    gen = jax.jit(generator_w1,
                  static_argnames=("block_m", "compute_dtype", "noise_std",
                                   "single_pass_max_b"))

    w_ref, b_ref = _reference_forward(x, params)

    # 1) single-pass fast path (noise off -> deterministic) vs. pure-JAX reference
    w0, b0 = gen(x, kn, params, noise_std=0.0)
    assert bool(jnp.allclose(w0, w_ref, atol=2e-2, rtol=2e-2)), "single-pass w mismatch"
    assert bool(jnp.allclose(b0, b_ref, atol=2e-2, rtol=2e-2)), "single-pass b mismatch"

    # 2) tiled 3-phase path (forced), exact full-batch BN across 4 batch tiles of 16
    wt, bt = gen(x, kn, params, noise_std=0.0, single_pass_max_b=0, block_m=16)
    assert bool(jnp.allclose(wt, w_ref, atol=2e-2, rtol=2e-2)), "tiled w mismatch"
    assert bool(jnp.allclose(bt, b_ref, atol=2e-2, rtol=2e-2)), "tiled b mismatch"

    # 3) tiled path with a ragged batch (zero padding + row-masked BN statistics)
    Br = 56
    xr = x[:Br]
    wr_ref, br_ref = _reference_forward(xr, params)
    wr, br = gen(xr, kn, params, noise_std=0.0, single_pass_max_b=0, block_m=16)
    assert bool(jnp.allclose(wr, wr_ref, atol=2e-2, rtol=2e-2)), "ragged w mismatch"
    assert bool(jnp.allclose(br, br_ref, atol=2e-2, rtol=2e-2)), "ragged b mismatch"

    # 4) real forward with N(0, 0.01) input noise
    w, b = gen(x, kn, params)
    jax.block_until_ready((w, b))

    assert w.shape == (B, 16, 3, 3, 3) and b.shape == (B, 16)
    assert bool(jnp.all(jnp.isfinite(w))) and bool(jnp.all(jnp.isfinite(b)))
    print("KERNEL_OK")
</pallas_src>

<mosaic_0001>
module attributes {stable_mosaic.version = 11 : i64} {
  func.func @_single_pass_kernel(%arg0: memref<64x32xf32, #tpu.memory_space<vmem>>, %arg1: memref<32x256xbf16, #tpu.memory_space<vmem>>, %arg2: memref<256x256xbf16, #tpu.memory_space<vmem>>, %arg3: memref<256x512xbf16, #tpu.memory_space<vmem>>, %arg4: memref<64x512xf32, #tpu.memory_space<vmem>>) attributes {dimension_semantics = [], scalar_prefetch = 0 : i64, scratch_operands = 0 : i64, tpu.core_type = #tpu.core_type<tc>} {
    %c0 = arith.constant 0 : index
    %c0_0 = arith.constant 0 : index
    %0 = vector.load %arg0[%c0, %c0_0] : memref<64x32xf32, #tpu.memory_space<vmem>>, vector<64x32xf32>
    %1 = arith.truncf %0 : vector<64x32xf32> to vector<64x32xbf16>
    %c0_1 = arith.constant 0 : index
    %c0_2 = arith.constant 0 : index
    %2 = vector.load %arg1[%c0_1, %c0_2] : memref<32x256xbf16, #tpu.memory_space<vmem>>, vector<32x256xbf16>
    %cst = arith.constant dense<0.000000e+00> : vector<64x256xf32>
    %3 = tpu.matmul %1, %2, %cst {dimension_numbers = #tpu.dot_dimension_numbers<[1], [0], [0], [1], [0, 0, 1, 1], [], []>} : vector<64x32xbf16>, vector<32x256xbf16>, vector<64x256xf32> -> vector<64x256xf32>
    %cst_3 = arith.constant dense<0.000000e+00> : vector<256xf32>
    %4 = vector.multi_reduction <add>, %3, %cst_3 [0] : vector<64x256xf32> to vector<256xf32>
    %5 = vector.shape_cast %4 : vector<256xf32> to vector<1x256xf32>
    %cst_4 = arith.constant 1.562500e-02 : f32
    %6 = vector.broadcast %cst_4 : f32 to vector<1x256xf32>
    %7 = arith.mulf %5, %6 : vector<1x256xf32>
    %8 = arith.mulf %3, %3 : vector<64x256xf32>
    %cst_5 = arith.constant dense<0.000000e+00> : vector<256xf32>
    %9 = vector.multi_reduction <add>, %8, %cst_5 [0] : vector<64x256xf32> to vector<256xf32>
    %10 = vector.shape_cast %9 : vector<256xf32> to vector<1x256xf32>
    %cst_6 = arith.constant 1.562500e-02 : f32
    %11 = vector.broadcast %cst_6 : f32 to vector<1x256xf32>
    %12 = arith.mulf %10, %11 : vector<1x256xf32>
    %13 = arith.mulf %7, %7 : vector<1x256xf32>
    %14 = arith.subf %12, %13 : vector<1x256xf32>
    %15 = vector.broadcast %7 : vector<1x256xf32> to vector<64x256xf32>
    %16 = arith.subf %3, %15 : vector<64x256xf32>
    %cst_7 = arith.constant 9.99999974E-6 : f32
    %17 = vector.broadcast %cst_7 : f32 to vector<1x256xf32>
    %18 = arith.addf %14, %17 : vector<1x256xf32>
    %19 = math.rsqrt %18 : vector<1x256xf32>
    %20 = vector.broadcast %19 : vector<1x256xf32> to vector<64x256xf32>
    %21 = arith.mulf %16, %20 : vector<64x256xf32>
    %cst_8 = arith.constant 0.000000e+00 : f32
    %22 = vector.broadcast %cst_8 : f32 to vector<64x256xf32>
    %23 = arith.maximumf %21, %22 : vector<64x256xf32>
    %24 = arith.truncf %23 : vector<64x256xf32> to vector<64x256xbf16>
    %c0_9 = arith.constant 0 : index
    %c0_10 = arith.constant 0 : index
    %25 = vector.load %arg2[%c0_9, %c0_10] : memref<256x256xbf16, #tpu.memory_space<vmem>>, vector<256x256xbf16>
    %cst_11 = arith.constant dense<0.000000e+00> : vector<64x256xf32>
    %26 = tpu.matmul %24, %25, %cst_11 {dimension_numbers = #tpu.dot_dimension_numbers<[1], [0], [0], [1], [0, 0, 1, 1], [], []>} : vector<64x256xbf16>, vector<256x256xbf16>, vector<64x256xf32> -> vector<64x256xf32>
    %cst_12 = arith.constant dense<0.000000e+00> : vector<256xf32>
    %27 = vector.multi_reduction <add>, %26, %cst_12 [0] : vector<64x256xf32> to vector<256xf32>
    %28 = vector.shape_cast %27 : vector<256xf32> to vector<1x256xf32>
    %cst_13 = arith.constant 1.562500e-02 : f32
    %29 = vector.broadcast %cst_13 : f32 to vector<1x256xf32>
    %30 = arith.mulf %28, %29 : vector<1x256xf32>
    %31 = arith.mulf %26, %26 : vector<64x256xf32>
    %cst_14 = arith.constant dense<0.000000e+00> : vector<256xf32>
    %32 = vector.multi_reduction <add>, %31, %cst_14 [0] : vector<64x256xf32> to vector<256xf32>
    %33 = vector.shape_cast %32 : vector<256xf32> to vector<1x256xf32>
    %cst_15 = arith.constant 1.562500e-02 : f32
    %34 = vector.broadcast %cst_15 : f32 to vector<1x256xf32>
    %35 = arith.mulf %33, %34 : vector<1x256xf32>
    %36 = arith.mulf %30, %30 : vector<1x256xf32>
    %37 = arith.subf %35, %36 : vector<1x256xf32>
    %38 = vector.broadcast %30 : vector<1x256xf32> to vector<64x256xf32>
    %39 = arith.subf %26, %38 : vector<64x256xf32>
    %cst_16 = arith.constant 9.99999974E-6 : f32
    %40 = vector.broadcast %cst_16 : f32 to vector<1x256xf32>
    %41 = arith.addf %37, %40 : vector<1x256xf32>
    %42 = math.rsqrt %41 : vector<1x256xf32>
    %43 = vector.broadcast %42 : vector<1x256xf32> to vector<64x256xf32>
    %44 = arith.mulf %39, %43 : vector<64x256xf32>
    %cst_17 = arith.constant 0.000000e+00 : f32
    %45 = vector.broadcast %cst_17 : f32 to vector<64x256xf32>
    %46 = arith.maximumf %44, %45 : vector<64x256xf32>
    %47 = arith.truncf %46 : vector<64x256xf32> to vector<64x256xbf16>
    %c0_18 = arith.constant 0 : index
    %c0_19 = arith.constant 0 : index
    %48 = vector.load %arg3[%c0_18, %c0_19] : memref<256x512xbf16, #tpu.memory_space<vmem>>, vector<256x512xbf16>
    %cst_20 = arith.constant dense<0.000000e+00> : vector<64x512xf32>
    %49 = tpu.matmul %47, %48, %cst_20 {dimension_numbers = #tpu.dot_dimension_numbers<[1], [0], [0], [1], [0, 0, 1, 1], [], []>} : vector<64x256xbf16>, vector<256x512xbf16>, vector<64x512xf32> -> vector<64x512xf32>
    %c0_21 = arith.constant 0 : index
    %c0_22 = arith.constant 0 : index
    %50 = vector.load %arg4[%c0_21, %c0_22] : memref<64x512xf32, #tpu.memory_space<vmem>>, vector<64x512xf32>
    tpu.vector_store %arg4[%c0_21, %c0_22], %49 {strides = array<i32>} : memref<64x512xf32, #tpu.memory_space<vmem>>, vector<64x512xf32>,
    return
  }
}

</mosaic_0001>

<bundles_post_ra>
// kernel: generator_w1.1
= control target key start
LH: loop header
LB: loop body
LE: loop exit
PB: predicated region body
PF: predicated region fallthrough
CT: control target
= control target key end

     0   :  { %vm54_vm0 = vcmask 261120   ;;  %s2962_s1 = inlined_call_operand.vmem [shape: bf16[32,256], index: 1, kind: input, shape index: {}]   ;;  %s2963_s0 = inlined_call_operand.vmem [shape: f32[64,32], index: 0, kind: input, shape index: {}]   ;;  %s2964_s2 = inlined_call_operand.vmem [shape: bf16[256,256], index: 2, kind: input, shape index: {}]   ;;  %s2965_s3 = inlined_call_operand.vmem [shape: bf16[256,512], index: 3, kind: input, shape index: {}]   ;;  %s2966_s4 = inlined_call_operand.vmem [shape: f32[64,512], index: 4, kind: output, shape index: {}]  }
   0x1   :  { %v1403_v0 = vld [vmem:[%s2962_s1 + $0x10] sm:$0xf]  ;;  %v1804_v1 = vld [vmem:[%s2962_s1 + $0x14] sm:$0xf0]  ;;  %v1803_v2 = vld [vmem:[%s2962_s1 + $0x14] sm:$0xf] }
   0x2   :  { %v1404_v3 = vor.u32 %v1804_v1, %v1403_v0  ;;  %v1405_v4 = vld [vmem:[%s2962_s1 + $0x18] sm:$0xf0]  ;;  %v1395_v5 = vld [vmem:[%s2962_s1] sm:$0xf]  ;;  %v1802_v6 = vld [vmem:[%s2962_s1 + $0x4] sm:$0xf0] }
   0x3   :  { %v1408_v7 = vor.u32 %v1803_v2, %v1405_v4  ;;  %v1801_v8 = vld [vmem:[%s2962_s1 + $0x4] sm:$0xf]  ;;  %v1397_v9 = vld [vmem:[%s2962_s1 + $0x8] sm:$0xf0]  ;;  %v1396_v11 = vor.u32 %v1802_v6, %v1395_v5  ;;  %v20_v18 = vld [vmem:[%s2963_s0 + $0x10] sm:$0xff] }
   0x4   :  { %v18_v10 = vld [vmem:[%s2963_s0] sm:$0xff]  ;;  %73 = vmatpush.bf16.msra.mxu0 %v1404_v3  ;;  %1901 = vmatpush.bf16.msra.mxu2 %v1404_v3  ;;  %v19_v12 = vld [vmem:[%s2963_s0 + $0x8] sm:$0xff]  ;;  %v1400_v15 = vor.u32 %v1801_v8, %v1397_v9  ;;  %v21_v19 = vld [vmem:[%s2963_s0 + $0x18] sm:$0xff] }
   0x5   :  { %v22_v13 = vld [vmem:[%s2963_s0 + $0x20] sm:$0xff]  ;;  %v23_v14 = vld [vmem:[%s2963_s0 + $0x28] sm:$0xff]  ;;  %102 = vmatpush.bf16.msra.mxu1 %v1408_v7  ;;  %1903 = vmatpush.bf16.msra.mxu3 %v1408_v7  ;;  %v26_v16 = vpack.c.bf16 %v19_v12, %v18_v10  ;;  %v24_v20 = vld [vmem:[%s2963_s0 + $0x30] sm:$0xff]  ;;  %v27_v22 = vpack.c.bf16 %v21_v19, %v20_v18 }
   0x6   :  { %v28_v17 = vpack.c.bf16 %v23_v14, %v22_v13  ;;  %v25_v21 = vld [vmem:[%s2963_s0 + $0x38] sm:$0xff]  ;;  %v1475_v31 = vld [vmem:[%s2964_s2 + $0x70] sm:$0xf]  ;;  %v1819_v37 = vld [vmem:[%s2964_s2 + $0x74] sm:$0xf] }
   0x7   :  { %v29_v23 = vpack.c.bf16 %v25_v21, %v24_v20  ;;  %v1820_v32 = vld [vmem:[%s2964_s2 + $0x74] sm:$0xf0]  ;;  %v1539_v33 = vld [vmem:[%s2964_s2 + $0xf0] sm:$0xf]  ;;  %v1477_v38 = vld [vmem:[%s2964_s2 + $0x78] sm:$0xf0] }
   0x8   :  { %74 = vmatpush.bf16.msra.mxu0 %v1396_v11  ;;  %1902 = vmatpush.bf16.msra.mxu2 %v1396_v11  ;;  %v1476_v35 = vor.u32 %v1820_v32, %v1475_v31  ;;  %v1836_v36 = vld [vmem:[%s2964_s2 + $0xf4] sm:$0xf0]  ;;  %v1480_v41 = vor.u32 %v1819_v37, %v1477_v38  ;;  %v1835_v42 = vld [vmem:[%s2964_s2 + $0xf4] sm:$0xf]  ;;  %v1541_v43 = vld [vmem:[%s2964_s2 + $0xf8] sm:$0xf0] }
   0x9   :  { %103 = vmatpush.bf16.msra.mxu1 %v1400_v15  ;;  %1904 = vmatpush.bf16.msra.mxu3 %v1400_v15  ;;  %v1540_v40 = vor.u32 %v1836_v36, %v1539_v33  ;;  %v1544_v45 = vor.u32 %v1835_v42, %v1541_v43  ;;  %v1467_v46 = vld [vmem:[%s2964_s2 + $0x60] sm:$0xf]  ;;  %v1818_v47 = vld [vmem:[%s2964_s2 + $0x64] sm:$0xf0]  ;;  %v1817_v52 = vld [vmem:[%s2964_s2 + $0x64] sm:$0xf] }
   0xa   :  { %v1531_v48 = vld [vmem:[%s2964_s2 + $0xe0] sm:$0xf]  ;;  %v1468_v50 = vor.u32 %v1818_v47, %v1467_v46  ;;  %v1834_v51 = vld [vmem:[%s2964_s2 + $0xe4] sm:$0xf0]  ;;  %v1469_v53 = vld [vmem:[%s2964_s2 + $0x68] sm:$0xf0] }
   0xb   :  { %1409 = vmatmul.msk.bf16.vlgmr.msra.gmra.mxu0 %vm54_vm0, %v26_v16  ;;  %1411 = vmatmul.msk.bf16.vlgmr.msra.gmra.mxu2 %vm54_vm0, %v28_v17  ;;  %v1532_v56 = vor.u32 %v1834_v51, %v1531_v48  ;;  %v1472_v57 = vor.u32 %v1817_v52, %v1469_v53  ;;  %v1833_v58 = vld [vmem:[%s2964_s2 + $0xe4] sm:$0xf]  ;;  %v1533_v59 = vld [vmem:[%s2964_s2 + $0xe8] sm:$0xf0]  ;;  %v1459_v4 = vld [vmem:[%s2964_s2 + $0x50] sm:$0xf] }
   0xc   :  { %1413 = vmatmul.msk.bf16.vlgmr.msra.gmra.mxu1 %vm54_vm0, %v26_v16  ;;  %1415 = vmatmul.msk.bf16.vlgmr.msra.gmra.mxu3 %vm54_vm0, %v28_v17  ;;  %v1536_v63 = vor.u32 %v1833_v58, %v1533_v59  ;;  %v1816_v5 = vld [vmem:[%s2964_s2 + $0x54] sm:$0xf0]  ;;  %v1523_v6 = vld [vmem:[%s2964_s2 + $0xd0] sm:$0xf]  ;;  %v1815_v13 = vld [vmem:[%s2964_s2 + $0x54] sm:$0xf] }
   0xd   :  { %471 = vmatpush.bf16.msrb.mxu2 %v1476_v35  ;;  %500 = vmatpush.bf16.msrb.mxu3 %v1540_v40  ;;  %v1460_v11 = vor.u32 %v1816_v5, %v1459_v4  ;;  %v1832_v12 = vld [vmem:[%s2964_s2 + $0xd4] sm:$0xf0]  ;;  %v1461_v14 = vld [vmem:[%s2964_s2 + $0x58] sm:$0xf0]  ;;  %v1831_v20 = vld [vmem:[%s2964_s2 + $0xd4] sm:$0xf] }
   0xe   :  { %529 = vmatpush.bf16.msrb.mxu0 %v1480_v41  ;;  %558 = vmatpush.bf16.msrb.mxu1 %v1544_v45  ;;  %v1524_v18 = vor.u32 %v1832_v12, %v1523_v6  ;;  %v1464_v19 = vor.u32 %v1815_v13, %v1461_v14  ;;  %v1525_v21 = vld [vmem:[%s2964_s2 + $0xd8] sm:$0xf0]  ;;  %v1451_v38 = vld [vmem:[%s2964_s2 + $0x40] sm:$0xf]  ;;  %v1814_v40 = vld [vmem:[%s2964_s2 + $0x44] sm:$0xf0] }
   0xf   :  { %v1528_v33 = vor.u32 %v1831_v20, %v1525_v21  ;;  %v1515_v41 = vld [vmem:[%s2964_s2 + $0xc0] sm:$0xf]  ;;  %v1452_v46 = vor.u32 %v1814_v40, %v1451_v38  ;;  %v1830_v47 = vld [vmem:[%s2964_s2 + $0xc4] sm:$0xf0]  ;;  %v1813_v48 = vld [vmem:[%s2964_s2 + $0x44] sm:$0xf] }
  0x10   :  { %v1516_v52 = vor.u32 %v1830_v47, %v1515_v41  ;;  %v1445_v12 = vld [vmem:[%s2964_s2 + $0x38] sm:$0xf0]  ;;  %v1499_v38 = vld [vmem:[%s2964_s2 + $0xa0] sm:$0xf] }
  0x11   :  { %472 = vmatpush.bf16.msrb.mxu2 %v1468_v50  ;;  %501 = vmatpush.bf16.msrb.mxu3 %v1532_v56 }
  0x12   :  { %530 = vmatpush.bf16.msrb.mxu0 %v1472_v57  ;;  %559 = vmatpush.bf16.msrb.mxu1 %v1536_v63 }
  0x15   :  { %473 = vmatpush.bf16.msrb.mxu2 %v1460_v11  ;;  %502 = vmatpush.bf16.msrb.mxu3 %v1524_v18  ;;  %v1811_v11 = vld [vmem:[%s2964_s2 + $0x34] sm:$0xf] }
  0x16   :  { %531 = vmatpush.bf16.msrb.mxu0 %v1464_v19  ;;  %560 = vmatpush.bf16.msrb.mxu1 %v1528_v33  ;;  %v1827_v18 = vld [vmem:[%s2964_s2 + $0xb4] sm:$0xf]  ;;  %v1509_v19 = vld [vmem:[%s2964_s2 + $0xb8] sm:$0xf0] }
  0x19   :  { %474 = vmatpush.bf16.msrb.mxu2 %v1452_v46  ;;  %503 = vmatpush.bf16.msrb.mxu3 %v1516_v52 }
  0x1b   :  { %1410 = vmatmul.msk.bf16.gmra.mxu0 %vm54_vm0, %v27_v22  ;;  %1412 = vmatmul.msk.bf16.gmra.mxu2 %vm54_vm0, %v29_v23 }
  0x1c   :  { %1414 = vmatmul.msk.bf16.gmra.mxu1 %vm54_vm0, %v27_v22  ;;  %1416 = vmatmul.msk.bf16.gmra.mxu3 %vm54_vm0, %v29_v23 }
  0x88   :  { %v1994_v24 = vpop.f32.mrf.mxu0 }
  0x89   :  { %v1996_v25 = vpop.f32.mrf.mxu1  ;;  %v153_v54 = vmul.f32 %v1994_v24, %v1994_v24 }
  0x8a   :  { %v154_v60 = vmul.f32 %v1996_v25, %v1996_v25 }
  0x8e   :  { %v1998_v26 = vpop.f32.mrf.mxu2 }
  0x8f   :  { %v2000_v27 = vpop.f32.mrf.mxu3  ;;  %v161_v0 = vmul.f32 %v1998_v26, %v1998_v26 }
  0x90   :  { %v2002_v28 = vpop.f32.mrf.mxu0  ;;  %v162_v7 = vmul.f32 %v2000_v27, %v2000_v27 }
  0x91   :  { %v2004_v29 = vpop.f32.mrf.mxu1  ;;  %v155_v49 = vmul.f32 %v2002_v28, %v2002_v28  ;;  %v125_v61 = vadd.f32 %v2002_v28, %v1994_v24 }
  0x92   :  { %v156_v55 = vmul.f32 %v2004_v29, %v2004_v29  ;;  %v138_v1 = vadd.f32 %v2004_v29, %v1996_v25 }
  0x93   :  { %v169_v9 = vadd.f32 %v155_v49, %v153_v54  ;;  %v1453_v49 = vld [vmem:[%s2964_s2 + $0x48] sm:$0xf0]  ;;  %v1829_v54 = vld [vmem:[%s2964_s2 + $0xc4] sm:$0xf] }
  0x94   :  { %v182_v16 = vadd.f32 %v156_v55, %v154_v60  ;;  %v1456_v53 = vor.u32 %v1813_v48, %v1453_v49  ;;  %v1517_v55 = vld [vmem:[%s2964_s2 + $0xc8] sm:$0xf0] }
  0x95   :  { %v1520_v59 = vor.u32 %v1829_v54, %v1517_v55  ;;  %v1437_v49 = vld [vmem:[%s2964_s2 + $0x28] sm:$0xf0] }
  0x96   :  { %v2006_v30 = vpop.f32.mrf.mxu2  ;;  %532 = vmatpush.bf16.msrb.mxu0 %v1456_v53  ;;  %v1501_v54 = vld [vmem:[%s2964_s2 + $0xa8] sm:$0xf0] }
  0x97   :  { %v2017_v34 = vpop.f32.mrf.mxu3  ;;  %v163_v42 = vmul.f32 %v2006_v30, %v2006_v30  ;;  %561 = vmatpush.bf16.msrb.mxu1 %v1520_v59  ;;  %v1808_v59 = vld [vmem:[%s2964_s2 + $0x14] sm:$0xf0] }
  0x98   :  { %v2028_v39 = vpop.f32.mrf.mxu0  ;;  %v164_v56 = vmul.f32 %v2017_v34, %v2017_v34 }
  0x99   :  { %v2036_v44 = vpop.f32.mrf.mxu1  ;;  %v157_v62 = vmul.f32 %v2028_v39, %v2028_v39  ;;  %v126_v8 = vadd.f32 %v125_v61, %v2028_v39 }
  0x9a   :  { %v158_v2 = vmul.f32 %v2036_v44, %v2036_v44  ;;  %v139_v15 = vadd.f32 %v138_v1, %v2036_v44  ;;  %v1443_v1 = vld [vmem:[%s2964_s2 + $0x30] sm:$0xf] }
  0x9b   :  { %v170_v22 = vadd.f32 %v169_v9, %v157_v62  ;;  %v1828_v9 = vld [vmem:[%s2964_s2 + $0xb4] sm:$0xf0] }
  0x9c   :  { %v183_v35 = vadd.f32 %v182_v16, %v158_v2  ;;  %v1507_v2 = vld [vmem:[%s2964_s2 + $0xb0] sm:$0xf] }
  0x9d   :  { %v1508_v16 = vor.u32 %v1828_v9, %v1507_v2 }
  0x9e   :  { %v2080_v3 = vpop.f32.mrf.mxu2 }
  0x9f   :  { %v2094_v10 = vpop.f32.mrf.mxu3  ;;  %v165_v60 = vmul.f32 %v2080_v3, %v2080_v3  ;;  %504 = vmatpush.bf16.msrb.mxu3 %v1508_v16 }
  0xa0   :  { %v2106_v17 = vpop.f32.mrf.mxu0  ;;  %v166_v4 = vmul.f32 %v2094_v10, %v2094_v10 }
  0xa1   :  { %v127_v23 = vadd.f32 %v126_v8, %v2106_v17  ;;  %v159_v31 = vmul.f32 %v2106_v17, %v2106_v17  ;;  %v2117_v32 = vpop.f32.mrf.mxu1 }
  0xa2   :  { %v140_v36 = vadd.f32 %v139_v15, %v2117_v32  ;;  %v160_v37 = vmul.f32 %v2117_v32, %v2117_v32 }
  0xa3   :  { %v128_v43 = vadd.f32 %v127_v23, %v1998_v26  ;;  %v171_v45 = vadd.f32 %v170_v22, %v159_v31  ;;  %v1448_v22 = vor.u32 %v1811_v11, %v1445_v12  ;;  %v1512_v23 = vor.u32 %v1827_v18, %v1509_v19  ;;  %v1419_v19 = vld [vmem:[%s2964_s2] sm:$0xf] }
  0xa4   :  { %v141_v50 = vadd.f32 %v140_v36, %v2000_v27  ;;  %v184_v51 = vadd.f32 %v183_v35, %v160_v37  ;;  %v1435_v36 = vld [vmem:[%s2964_s2 + $0x20] sm:$0xf]  ;;  %v1810_v37 = vld [vmem:[%s2964_s2 + $0x24] sm:$0xf0] }
  0xa5   :  { %v172_v57 = vadd.f32 %v171_v45, %v161_v0  ;;  %v129_v58 = vadd.f32 %v128_v43, %v2006_v30  ;;  %v1812_v0 = vld [vmem:[%s2964_s2 + $0x34] sm:$0xf0]  ;;  %533 = vmatpush.bf16.msrb.mxu0 %v1448_v22  ;;  %562 = vmatpush.bf16.msrb.mxu1 %v1512_v23  ;;  %v1826_v43 = vld [vmem:[%s2964_s2 + $0xa4] sm:$0xf0]  ;;  %v1809_v45 = vld [vmem:[%s2964_s2 + $0x24] sm:$0xf] }
  0xa6   :  { %v185_v61 = vadd.f32 %v184_v51, %v162_v7  ;;  %v2155_v62 = vpop.f32.mrf.mxu2  ;;  %v142_v63 = vadd.f32 %v141_v50, %v2017_v34  ;;  %v1444_v8 = vor.u32 %v1812_v0, %v1443_v1  ;;  %v1500_v48 = vor.u32 %v1826_v43, %v1499_v38  ;;  %v1825_v50 = vld [vmem:[%s2964_s2 + $0xa4] sm:$0xf]  ;;  %v1491_v1 = vld [vmem:[%s2964_s2 + $0x90] sm:$0xf]  ;;  %v1824_v0 = vld [vmem:[%s2964_s2 + $0x94] sm:$0xf0] }
  0xa7   :  { %v130_v5 = vadd.f32 %v129_v58, %v2080_v3  ;;  %v173_v6 = vadd.f32 %v172_v57, %v163_v42  ;;  %v2170_v7 = vpop.f32.mrf.mxu3  ;;  %v167_v13 = vmul.f32 %v2155_v62, %v2155_v62  ;;  %v1436_v42 = vor.u32 %v1810_v37, %v1435_v36  ;;  %v1427_v58 = vld [vmem:[%s2964_s2 + $0x10] sm:$0xf]  ;;  %v1805_v38 = vld [vmem:[%s2964_s2 + $0x4] sm:$0xf] }
  0xa8   :  { %v143_v14 = vadd.f32 %v142_v63, %v2094_v10  ;;  %v186_v15 = vadd.f32 %v185_v61, %v164_v56  ;;  %475 = vmatpush.bf16.msrb.mxu2 %v1444_v8  ;;  %v168_v33 = vmul.f32 %v2170_v7, %v2170_v7  ;;  %v1440_v53 = vor.u32 %v1809_v45, %v1437_v49  ;;  %v1429_v8 = vld [vmem:[%s2964_s2 + $0x18] sm:$0xf0]  ;;  %v1821_v45 = vld [vmem:[%s2964_s2 + $0x84] sm:$0xf] }
  0xa9   :  { %v131_v20 = vadd.f32 %v130_v5, %v2155_v62  ;;  %v174_v21 = vadd.f32 %v173_v6, %v165_v60  ;;  %505 = vmatpush.bf16.msrb.mxu3 %v1500_v48  ;;  %v1504_v57 = vor.u32 %v1825_v50, %v1501_v54  ;;  %v1428_v63 = vor.u32 %v1808_v59, %v1427_v58  ;;  %v1807_v6 = vld [vmem:[%s2964_s2 + $0x14] sm:$0xf] }
  0xaa   :  { %v144_v31 = vadd.f32 %v143_v14, %v2170_v7  ;;  %v187_v35 = vadd.f32 %v186_v15, %v166_v4  ;;  %534 = vmatpush.bf16.msrb.mxu0 %v1440_v53  ;;  %v1492_v5 = vor.u32 %v1824_v0, %v1491_v1  ;;  %v1432_v12 = vor.u32 %v1807_v6, %v1429_v8  ;;  %v1493_v14 = vld [vmem:[%s2964_s2 + $0x98] sm:$0xf0] }
  0xab   :  { %v132_v40 = vrot.slane %v131_v20, 4  ;;  %v175_v41 = vadd.f32 %v174_v21, %v167_v13  ;;  %563 = vmatpush.bf16.msrb.mxu1 %v1504_v57  ;;  %v1823_v13 = vld [vmem:[%s2964_s2 + $0x94] sm:$0xf] }
  0xac   :  { %v145_v46 = vrot.slane %v144_v31, 4  ;;  %v188_v47 = vadd.f32 %v187_v35, %v168_v33  ;;  %476 = vmatpush.bf16.msrb.mxu2 %v1436_v42  ;;  %v1496_v18 = vor.u32 %v1823_v13, %v1493_v14  ;;  %v1822_v33 = vld [vmem:[%s2964_s2 + $0x84] sm:$0xf0] }
  0xad   :  { %v133_v51 = vadd.f32 %v132_v40, %v131_v20  ;;  %v176_v52 = vrot.slane %v175_v41, 4  ;;  %506 = vmatpush.bf16.msrb.mxu3 %v1492_v5  ;;  %v1806_v20 = vld [vmem:[%s2964_s2 + $0x4] sm:$0xf0]  ;;  %v1421_v40 = vld [vmem:[%s2964_s2 + $0x8] sm:$0xf0] }
  0xae   :  { %v146_v55 = vadd.f32 %v145_v46, %v144_v31  ;;  %v189_v56 = vrot.slane %v188_v47, 4  ;;  %535 = vmatpush.bf16.msrb.mxu0 %v1432_v12  ;;  %v1420_v23 = vor.u32 %v1806_v20, %v1419_v19  ;;  %v1483_v31 = vld [vmem:[%s2964_s2 + $0x80] sm:$0xf]  ;;  %v1424_v43 = vor.u32 %v1805_v38, %v1421_v40  ;;  %v1485_v46 = vld [vmem:[%s2964_s2 + $0x88] sm:$0xf0] }
  0xaf   :  { %v134_v60 = vrot.slane %v133_v51, 2  ;;  %v177_v61 = vadd.f32 %v176_v52, %v175_v41  ;;  %564 = vmatpush.bf16.msrb.mxu1 %v1496_v18  ;;  %v1484_v37 = vor.u32 %v1822_v33, %v1483_v31  ;;  %v1488_v49 = vor.u32 %v1821_v45, %v1485_v46 }
  0xb0   :  { %v147_v2 = vrot.slane %v146_v55, 2  ;;  %v190_v4 = vadd.f32 %v189_v56, %v188_v47  ;;  %477 = vmatpush.bf16.msrb.mxu2 %v1428_v63 }
  0xb1   :  { %v135_v9 = vadd.f32 %v134_v60, %v133_v51  ;;  %v178_v11 = vrot.slane %v177_v61, 2  ;;  %507 = vmatpush.bf16.msrb.mxu3 %v1484_v37 }
  0xb2   :  { %v148_v15 = vadd.f32 %v147_v2, %v146_v55  ;;  %v191_v16 = vrot.slane %v190_v4, 2  ;;  %536 = vmatpush.bf16.msrb.mxu0 %v1424_v43 }
  0xb3   :  { %v136_v21 = vrot.slane %v135_v9, 1  ;;  %v179_v22 = vadd.f32 %v178_v11, %v177_v61  ;;  %565 = vmatpush.bf16.msrb.mxu1 %v1488_v49 }
  0xb4   :  { %v149_v35 = vrot.slane %v148_v15, 1  ;;  %v192_v36 = vadd.f32 %v191_v16, %v190_v4  ;;  %478 = vmatpush.bf16.msrb.mxu2 %v1420_v23 }
  0xb5   :  { %v137_v41 = vadd.f32 %v136_v21, %v135_v9  ;;  %v180_v42 = vrot.slane %v179_v22, 1 }
  0xb6   :  { %v150_v47 = vadd.f32 %v149_v35, %v148_v15  ;;  %v193_v48 = vrot.slane %v192_v36, 1 }
  0xb7   :  { %v2266_v50 = vmul.f32 0.015625, %v137_v41  ;;  %v181_v51 = vadd.f32 %v180_v42, %v179_v22 }
  0xb8   :  { %v2268_v52 = vmul.f32 0.015625, %v150_v47  ;;  %v194_v53 = vadd.f32 %v193_v48, %v192_v36 }
  0xb9   :  { %v195_v54 = vmul.f32 0.015625, %v181_v51  ;;  %v197_v55 = vmul.f32 %v2266_v50, %v2266_v50  ;;  %v213_v63 = vsub.f32 %v2080_v3, %v2266_v50  ;;  %v203_v15 = vsub.f32 %v2002_v28, %v2266_v50 }
  0xba   :  { %v196_v56 = vmul.f32 0.015625, %v194_v53  ;;  %v198_v57 = vmul.f32 %v2268_v52, %v2268_v52  ;;  %v214_v1 = vsub.f32 %v2094_v10, %v2268_v52  ;;  %v201_v10 = vsub.f32 %v1994_v24, %v2266_v50 }
  0xbb   :  { %v199_v58 = vsub.f32 %v195_v54, %v197_v55  ;;  %v202_v18 = vsub.f32 %v1996_v25, %v2268_v52  ;;  %v204_v19 = vsub.f32 %v2004_v29, %v2268_v52  ;;  %v215_v28 = vsub.f32 %v2155_v62, %v2266_v50 }
  0xbc   :  { %v200_v59 = vsub.f32 %v196_v56, %v198_v57  ;;  %v216_v25 = vsub.f32 %v2170_v7, %v2268_v52  ;;  %v205_v47 = vsub.f32 %v2028_v39, %v2266_v50  ;;  %v207_v62 = vsub.f32 %v2106_v17, %v2266_v50 }
  0xbd   :  { %v217_v60 = vadd.f32 1e-05, %v199_v58  ;;  %v206_v7 = vsub.f32 %v2036_v44, %v2268_v52  ;;  %v208_v49 = vsub.f32 %v2117_v32, %v2268_v52  ;;  %v209_v44 = vsub.f32 %v1998_v26, %v2266_v50 }
  0xbe   :  { %v218_v61 = vadd.f32 1e-05, %v200_v59  ;;  %v211_v17 = vsub.f32 %v2006_v30, %v2266_v50  ;;  %v210_v32 = vsub.f32 %v2000_v27, %v2268_v52 }
  0xbf   :  { %1905 = vrsqrt.f32 %v217_v60  ;;  %vm225_vm3 = vweird.f32 %v217_v60 }
  0xc0   :  { %1907 = vrsqrt.f32 %v218_v61  ;;  %vm235_vm5 = vweird.f32 %v218_v61 }
  0xc5   :  { %v1906_v0 = vpop.eup %1905 }
  0xc6   :  { %v1908_v2 = vpop.eup %1907  ;;  %v220_v4 = vmul.f32 %v1906_v0, %v217_v60  ;;  %vm226_vm1 = vweird.f32 %v1906_v0 }
  0xc7   :  { %v230_v5 = vmul.f32 %v1908_v2, %v218_v61  ;;  %vm236_vm2 = vweird.f32 %v1908_v2  ;;  %vm227_vm4 = vmor %vm225_vm3, %vm226_vm1 }
  0xc8   :  { %v221_v6 = vmul.f32 %v1906_v0, %v220_v4  ;;  %vm237_vm6 = vmor %vm235_vm5, %vm236_vm2 }
  0xc9   :  { %v231_v8 = vmul.f32 %v1908_v2, %v230_v5 }
  0xca   :  { %v222_v9 = vmul.f32 0.5, %v221_v6 }
  0xcb   :  { %v232_v11 = vmul.f32 0.5, %v231_v8 }
  0xcc   :  { %v223_v12 = vsub.f32 1.5, %v222_v9 }
  0xcd   :  { %v233_v13 = vsub.f32 1.5, %v232_v11 }
  0xce   :  { %v224_v14 = vmul.f32 %v1906_v0, %v223_v12 }
  0xcf   :  { %v234_v3 = vmul.f32 %v1908_v2, %v233_v13 }
  0xd0   :  { %v228_v16 = vsel %vm227_vm4, %v1906_v0, %v224_v14 }
  0xd1   :  { %v239_v20 = vmul.f32 %v228_v16, %v201_v10  ;;  %v241_v21 = vmul.f32 %v228_v16, %v203_v15  ;;  %v238_v22 = vsel %vm237_vm6, %v1908_v2, %v234_v3  ;;  %v251_v29 = vmul.f32 %v228_v16, %v213_v63 }
  0xd2   :  { %v240_v23 = vmul.f32 %v238_v22, %v202_v18  ;;  %v242_v31 = vmul.f32 %v238_v22, %v204_v19  ;;  %v253_v40 = vmul.f32 %v228_v16, %v215_v28  ;;  %v252_v41 = vmul.f32 %v238_v22, %v214_v1  ;;  %v1867_v18 = vld [vmem:[%s2965_s3 + $0xec] sm:$0xf0]  ;;  %v1787_v19 = vld [vmem:[%s2965_s3 + $0x1e0] sm:$0xf] }
  0xd3   :  { %v255_v33 = vmax.f32 %v239_v20, 0.0  ;;  %v257_v35 = vmax.f32 %v241_v21, 0.0  ;;  %v267_v42 = vmax.f32 %v251_v29, 0.0  ;;  %v254_v43 = vmul.f32 %v238_v22, %v216_v25  ;;  %v1899_v21 = vld [vmem:[%s2965_s3 + $0x1ec] sm:$0xf0] }
  0xd4   :  { %v256_v36 = vmax.f32 %v240_v23, 0.0  ;;  %v258_v24 = vmax.f32 %v242_v31, 0.0  ;;  %v269_v45 = vmax.f32 %v253_v40, 0.0  ;;  %v268_v46 = vmax.f32 %v252_v41, 0.0  ;;  %v1865_v31 = vld [vmem:[%s2965_s3 + $0xe4] sm:$0xf] }
  0xd5   :  { %v271_v37 = vpack.c.bf16 %v257_v35, %v255_v33  ;;  %v270_v48 = vmax.f32 %v254_v43, 0.0  ;;  %v243_v53 = vmul.f32 %v228_v16, %v205_v47  ;;  %v245_v54 = vmul.f32 %v228_v16, %v207_v62  ;;  %v1661_v33 = vld [vmem:[%s2965_s3 + $0xf0] sm:$0xf0]  ;;  %v1897_v35 = vld [vmem:[%s2965_s3 + $0x1e4] sm:$0xf] }
  0xd6   :  { %v272_v38 = vpack.c.bf16 %v258_v24, %v256_v36  ;;  %v277_v51 = vpack.c.bf16 %v269_v45, %v267_v42  ;;  %v244_v56 = vmul.f32 %v238_v22, %v206_v7  ;;  %v246_v57 = vmul.f32 %v238_v22, %v208_v49  ;;  %v1643_v29 = vld [vmem:[%s2965_s3 + $0xc0] sm:$0xf]  ;;  %v1863_v40 = vld [vmem:[%s2965_s3 + $0xcc] sm:$0xf0] }
  0xd7   :  { %479 = vmatmul.bf16.vlgmr.msrb.gmra.mxu2 %v271_v37  ;;  %537 = vmatmul.bf16.vlgmr.msrb.gmra.mxu0 %v271_v37  ;;  %v278_v55 = vpack.c.bf16 %v270_v48, %v268_v46  ;;  %v259_v58 = vmax.f32 %v243_v53, 0.0  ;;  %v261_v59 = vmax.f32 %v245_v54, 0.0  ;;  %v212_v1 = vsub.f32 %v2017_v34, %v2268_v52  ;;  %v1789_v37 = vld [vmem:[%s2965_s3 + $0x1f0] sm:$0xf0]  ;;  %v1771_v41 = vld [vmem:[%s2965_s3 + $0x1c0] sm:$0xf] }
  0xd8   :  { %508 = vmatmul.bf16.vlgmr.msrb.gmra.mxu3 %v272_v38  ;;  %566 = vmatmul.bf16.vlgmr.msrb.gmra.mxu1 %v272_v38  ;;  %v260_v60 = vmax.f32 %v244_v56, 0.0  ;;  %v262_v39 = vmax.f32 %v246_v57, 0.0  ;;  %v247_v0 = vmul.f32 %v228_v16, %v209_v44  ;;  %v249_v2 = vmul.f32 %v228_v16, %v211_v17  ;;  %v1659_v16 = vld [vmem:[%s2965_s3 + $0xe0] sm:$0xf]  ;;  %v1895_v43 = vld [vmem:[%s2965_s3 + $0x1cc] sm:$0xf0] }
  0xd9   :  { %v273_v61 = vpack.c.bf16 %v261_v59, %v259_v58  ;;  %v248_v4 = vmul.f32 %v238_v22, %v210_v32  ;;  %v250_v5 = vmul.f32 %v238_v22, %v212_v1  ;;  %v1660_v20 = vor.u32 %v1867_v18, %v1659_v16 }
  0xda   :  { %v274_v63 = vpack.c.bf16 %v262_v39, %v260_v60  ;;  %v263_v6 = vmax.f32 %v247_v0, 0.0  ;;  %v265_v8 = vmax.f32 %v249_v2, 0.0  ;;  %v1788_v23 = vor.u32 %v1899_v21, %v1787_v19 }
  0xdb   :  { %v264_v9 = vmax.f32 %v248_v4, 0.0  ;;  %v266_v11 = vmax.f32 %v250_v5, 0.0  ;;  %1125 = vmatpush.bf16.msra.mxu2 %v1660_v20  ;;  %v1664_v24 = vor.u32 %v1865_v31, %v1661_v33  ;;  %v1792_v38 = vor.u32 %v1897_v35, %v1789_v37  ;;  %v1755_v35 = vld [vmem:[%s2965_s3 + $0x1a0] sm:$0xf] }
  0xdc   :  { %v275_v12 = vpack.c.bf16 %v265_v8, %v263_v6  ;;  %1154 = vmatpush.bf16.msra.mxu3 %v1788_v23  ;;  %v1644_v42 = vor.u32 %v1863_v40, %v1643_v29  ;;  %v1772_v46 = vor.u32 %v1895_v43, %v1771_v41  ;;  %v1757_v40 = vld [vmem:[%s2965_s3 + $0x1b0] sm:$0xf0] }
  0xdd   :  { %v276_v13 = vpack.c.bf16 %v266_v11, %v264_v9  ;;  %1183 = vmatpush.bf16.msra.mxu0 %v1664_v24  ;;  %1212 = vmatpush.bf16.msra.mxu1 %v1792_v38  ;;  %v1889_v24 = vld [vmem:[%s2965_s3 + $0x1a4] sm:$0xf] }
  0xdf   :  { %1126 = vmatpush.bf16.msra.mxu2 %v1644_v42 }
  0xe0   :  { %1155 = vmatpush.bf16.msra.mxu3 %v1772_v46  ;;  %v1861_v46 = vld [vmem:[%s2965_s3 + $0xc4] sm:$0xf] }
  0xe7   :  { %484 = vmatmul.bf16.gmra.mxu2 %v273_v61  ;;  %542 = vmatmul.bf16.gmra.mxu0 %v273_v61 }
  0xe8   :  { %513 = vmatmul.bf16.gmra.mxu3 %v274_v63  ;;  %571 = vmatmul.bf16.gmra.mxu1 %v274_v63 }
  0xf7   :  { %489 = vmatmul.bf16.gmra.mxu2 %v275_v12  ;;  %547 = vmatmul.bf16.gmra.mxu0 %v275_v12 }
  0xf8   :  { %518 = vmatmul.bf16.gmra.mxu3 %v276_v13  ;;  %576 = vmatmul.bf16.gmra.mxu1 %v276_v13 }
 0x107   :  { %494 = vmatmul.bf16.gmra.mxu2 %v277_v51  ;;  %552 = vmatmul.bf16.gmra.mxu0 %v277_v51 }
 0x108   :  { %523 = vmatmul.bf16.gmra.mxu3 %v278_v55  ;;  %581 = vmatmul.bf16.gmra.mxu1 %v278_v55 }
 0x154   :  { %v538_v26 = vpop.f32.mrf.mxu0 }
 0x155   :  { %v567_v27 = vpop.f32.mrf.mxu1 }
 0x156   :  { %v2344_v55 = vadd.f32 %v567_v27, %v538_v26  ;;  %v1893_v27 = vld [vmem:[%s2965_s3 + $0x1c4] sm:$0xf] }
 0x158   :  { %v616_v39 = vmul.f32 %v2344_v55, %v2344_v55 }
 0x15a   :  { %v480_v30 = vpop.f32.mrf.mxu2 }
 0x15b   :  { %v509_v34 = vpop.f32.mrf.mxu3 }
 0x15c   :  { %v540_v50 = vpop.f32.mrf.mxu0  ;;  %v2356_v61 = vadd.f32 %v509_v34, %v480_v30  ;;  %v1773_v30 = vld [vmem:[%s2965_s3 + $0x1d0] sm:$0xf0] }
 0x15d   :  { %v569_v52 = vpop.f32.mrf.mxu1 }
 0x15e   :  { %v2342_v53 = vadd.f32 %v569_v52, %v540_v50  ;;  %v615_v11 = vmul.f32 %v2356_v61, %v2356_v61 }
 0x160   :  { %v618_v57 = vmul.f32 %v2342_v53, %v2342_v53  ;;  %v600_v32 = vadd.f32 %v2342_v53, %v2344_v55 }
 0x162   :  { %v482_v14 = vpop.f32.mrf.mxu2  ;;  %v644_v2 = vadd.f32 %v618_v57, %v616_v39  ;;  %v1739_v39 = vld [vmem:[%s2965_s3 + $0x180] sm:$0xf] }
 0x163   :  { %v511_v3 = vpop.f32.mrf.mxu3 }
 0x164   :  { %v543_v10 = vpop.f32.mrf.mxu0  ;;  %v2350_v58 = vadd.f32 %v511_v3, %v482_v14  ;;  %v1776_v14 = vor.u32 %v1893_v27, %v1773_v30  ;;  %v1857_v27 = vld [vmem:[%s2965_s3 + $0xa4] sm:$0xf] }
 0x165   :  { %v572_v15 = vpop.f32.mrf.mxu1 }
 0x166   :  { %v2346_v56 = vadd.f32 %v572_v15, %v543_v10  ;;  %v617_v4 = vmul.f32 %v2350_v58, %v2350_v58  ;;  %v587_v3 = vadd.f32 %v2350_v58, %v2356_v61  ;;  %1213 = vmatpush.bf16.msra.mxu1 %v1776_v14 }
 0x168   :  { %v620_v63 = vmul.f32 %v2346_v56, %v2346_v56  ;;  %v601_v6 = vadd.f32 %v600_v32, %v2346_v56  ;;  %v631_v10 = vadd.f32 %v617_v4, %v615_v11 }
 0x16a   :  { %v485_v22 = vpop.f32.mrf.mxu2  ;;  %v645_v12 = vadd.f32 %v644_v2, %v620_v63  ;;  %v1887_v63 = vld [vmem:[%s2965_s3 + $0x18c] sm:$0xf0] }
 0x16b   :  { %v514_v36 = vpop.f32.mrf.mxu3  ;;  %v1740_v4 = vor.u32 %v1887_v63, %v1739_v39 }
 0x16c   :  { %v545_v28 = vpop.f32.mrf.mxu0  ;;  %v2360_v44 = vadd.f32 %v514_v36, %v485_v22  ;;  %v1891_v36 = vld [vmem:[%s2965_s3 + $0x1ac] sm:$0xf0] }
 0x16d   :  { %v574_v25 = vpop.f32.mrf.mxu1  ;;  %v1756_v29 = vor.u32 %v1891_v36, %v1755_v35 }
 0x16e   :  { %v2352_v59 = vadd.f32 %v574_v25, %v545_v28  ;;  %v619_v13 = vmul.f32 %v2360_v44, %v2360_v44  ;;  %v588_v21 = vadd.f32 %v587_v3, %v2360_v44 }
 0x16f   :  { %1156 = vmatpush.bf16.msra.mxu3 %v1756_v29  ;;  %v1853_v29 = vld [vmem:[%s2965_s3 + $0x84] sm:$0xf] }
 0x170   :  { %v622_v8 = vmul.f32 %v2352_v59, %v2352_v59  ;;  %v602_v34 = vadd.f32 %v601_v6, %v2352_v59  ;;  %v632_v22 = vadd.f32 %v631_v10, %v619_v13  ;;  %v1859_v13 = vld [vmem:[%s2965_s3 + $0xac] sm:$0xf0]  ;;  %v1629_v10 = vld [vmem:[%s2965_s3 + $0xb0] sm:$0xf0] }
 0x172   :  { %v487_v45 = vpop.f32.mrf.mxu2  ;;  %v646_v16 = vadd.f32 %v645_v12, %v622_v8  ;;  %v1627_v12 = vld [vmem:[%s2965_s3 + $0xa0] sm:$0xf] }
 0x173   :  { %v516_v47 = vpop.f32.mrf.mxu3  ;;  %v1628_v3 = vor.u32 %v1859_v13, %v1627_v12  ;;  %1157 = vmatpush.bf16.msra.mxu3 %v1740_v4  ;;  %v1597_v13 = vld [vmem:[%s2965_s3 + $0x70] sm:$0xf0] }
 0x174   :  { %v548_v62 = vpop.f32.mrf.mxu0  ;;  %v2377_v26 = vadd.f32 %v516_v47, %v487_v45  ;;  %v1645_v47 = vld [vmem:[%s2965_s3 + $0xd0] sm:$0xf0] }
 0x175   :  { %v577_v48 = vpop.f32.mrf.mxu1  ;;  %1127 = vmatpush.bf16.msra.mxu2 %v1628_v3 }
 0x176   :  { %v2364_v1 = vadd.f32 %v577_v48, %v548_v62  ;;  %v621_v23 = vmul.f32 %v2377_v26, %v2377_v26  ;;  %v589_v41 = vadd.f32 %v588_v21, %v2377_v26  ;;  %v1760_v62 = vor.u32 %v1889_v24, %v1757_v40  ;;  %v1723_v21 = vld [vmem:[%s2965_s3 + $0x160] sm:$0xf] }
 0x178   :  { %v624_v50 = vmul.f32 %v2364_v1, %v2364_v1  ;;  %v603_v18 = vadd.f32 %v602_v34, %v2364_v1  ;;  %1214 = vmatpush.bf16.msra.mxu1 %v1760_v62 }
 0x17a   :  { %v490_v7 = vpop.f32.mrf.mxu2  ;;  %v647_v37 = vadd.f32 %v646_v16, %v624_v50 }
 0x17b   :  { %v519_v49 = vpop.f32.mrf.mxu3 }
 0x17c   :  { %v550_v51 = vpop.f32.mrf.mxu0  ;;  %v2392_v15 = vadd.f32 %v519_v49, %v490_v7 }
 0x17d   :  { %v579_v54 = vpop.f32.mrf.mxu1 }
 0x17e   :  { %v2371_v9 = vadd.f32 %v579_v54, %v550_v51  ;;  %v623_v42 = vmul.f32 %v2392_v15, %v2392_v15  ;;  %v1648_v51 = vor.u32 %v1861_v46, %v1645_v47  ;;  %v633_v54 = vadd.f32 %v632_v22, %v621_v23  ;;  %v1883_v22 = vld [vmem:[%s2965_s3 + $0x16c] sm:$0xf0]  ;;  %v1881_v23 = vld [vmem:[%s2965_s3 + $0x164] sm:$0xf]  ;;  %v1613_v47 = vld [vmem:[%s2965_s3 + $0x90] sm:$0xf0] }
 0x17f   :  { %v590_v57 = vadd.f32 %v589_v41, %v2392_v15  ;;  %v1724_v24 = vor.u32 %v1883_v22, %v1723_v21  ;;  %v1847_v21 = vld [vmem:[%s2965_s3 + $0x4c] sm:$0xf0]  ;;  %v1845_v22 = vld [vmem:[%s2965_s3 + $0x44] sm:$0xf] }
 0x180   :  { %v626_v19 = vmul.f32 %v2371_v9, %v2371_v9  ;;  %v604_v28 = vadd.f32 %v603_v18, %v2371_v9  ;;  %1184 = vmatpush.bf16.msra.mxu0 %v1648_v51  ;;  %v634_v6 = vadd.f32 %v633_v54, %v623_v42  ;;  %v1879_v51 = vld [vmem:[%s2965_s3 + $0x14c] sm:$0xf0]  ;;  %v1877_v54 = vld [vmem:[%s2965_s3 + $0x144] sm:$0xf] }
 0x181   :  { %1158 = vmatpush.bf16.msra.mxu3 %v1724_v24 }
 0x182   :  { %v492_v60 = vpop.f32.mrf.mxu2  ;;  %v648_v48 = vadd.f32 %v647_v37, %v626_v19  ;;  %v1725_v37 = vld [vmem:[%s2965_s3 + $0x170] sm:$0xf0] }
 0x183   :  { %v521_v17 = vpop.f32.mrf.mxu3  ;;  %v1728_v40 = vor.u32 %v1881_v23, %v1725_v37 }
 0x184   :  { %v553_v0 = vpop.f32.mrf.mxu0  ;;  %v2400_v31 = vadd.f32 %v521_v17, %v492_v60  ;;  %v1885_v17 = vld [vmem:[%s2965_s3 + $0x184] sm:$0xf] }
 0x185   :  { %v582_v5 = vpop.f32.mrf.mxu1 }
 0x186   :  { %v2388_v52 = vadd.f32 %v582_v5, %v553_v0  ;;  %v625_v60 = vmul.f32 %v2400_v31, %v2400_v31  ;;  %v1741_v5 = vld [vmem:[%s2965_s3 + $0x190] sm:$0xf0]  ;;  %v591_v8 = vadd.f32 %v590_v57, %v2400_v31 }
 0x187   :  { %v1744_v30 = vor.u32 %v1885_v17, %v1741_v5  ;;  %v1709_v17 = vld [vmem:[%s2965_s3 + $0x150] sm:$0xf0] }
 0x188   :  { %v628_v38 = vmul.f32 %v2388_v52, %v2388_v52  ;;  %v605_v7 = vadd.f32 %v604_v28, %v2388_v52  ;;  %v635_v16 = vadd.f32 %v634_v6, %v625_v60  ;;  %v1712_v5 = vor.u32 %v1877_v54, %v1709_v17  ;;  %v1843_v54 = vld [vmem:[%s2965_s3 + $0x2c] sm:$0xf0] }
 0x189   :  { %1215 = vmatpush.bf16.msra.mxu1 %v1744_v30 }
 0x18a   :  { %v495_v20 = vpop.f32.mrf.mxu2  ;;  %v649_v32 = vadd.f32 %v648_v48, %v628_v38  ;;  %v1611_v38 = vld [vmem:[%s2965_s3 + $0x80] sm:$0xf]  ;;  %v1616_v48 = vor.u32 %v1853_v29, %v1613_v47 }
 0x18b   :  { %v524_v33 = vpop.f32.mrf.mxu3 }
 0x18c   :  { %v555_v25 = vpop.f32.mrf.mxu0  ;;  %v2420_v43 = vadd.f32 %v524_v33, %v495_v20  ;;  %v1632_v20 = vor.u32 %v1857_v27, %v1629_v10 }
 0x18d   :  { %v584_v45 = vpop.f32.mrf.mxu1  ;;  %1216 = vmatpush.bf16.msra.mxu1 %v1728_v40  ;;  %v1675_v40 = vld [vmem:[%s2965_s3 + $0x100] sm:$0xf] }
 0x18e   :  { %v2429_v49 = vadd.f32 %v584_v45, %v555_v25  ;;  %v627_v11 = vmul.f32 %v2420_v43, %v2420_v43  ;;  %v592_v18 = vadd.f32 %v591_v8, %v2420_v43  ;;  %1185 = vmatpush.bf16.msra.mxu0 %v1632_v20  ;;  %v1855_v25 = vld [vmem:[%s2965_s3 + $0x8c] sm:$0xf0]  ;;  %v1579_v20 = vld [vmem:[%s2965_s3 + $0x40] sm:$0xf] }
 0x18f   :  { %v1612_v62 = vor.u32 %v1855_v25, %v1611_v38  ;;  %v1581_v38 = vld [vmem:[%s2965_s3 + $0x50] sm:$0xf0]  ;;  %v1580_v25 = vor.u32 %v1847_v21, %v1579_v20  ;;  %v1669_v20 = vld [vmem:[%s2965_s3 + $0xf8] sm:$0xf0] }
 0x190   :  { %v606_v0 = vadd.f32 %v605_v7, %v2429_v49  ;;  %v630_v2 = vmul.f32 %v2429_v49, %v2429_v49  ;;  %v636_v28 = vadd.f32 %v635_v16, %v627_v11  ;;  %v1707_v7 = vld [vmem:[%s2965_s3 + $0x140] sm:$0xf]  ;;  %v1584_v29 = vor.u32 %v1845_v22, %v1581_v38  ;;  %v1651_v38 = vld [vmem:[%s2965_s3 + $0xc8] sm:$0xf] }
 0x191   :  { %1128 = vmatpush.bf16.msra.mxu2 %v1612_v62  ;;  %v1708_v4 = vor.u32 %v1879_v51, %v1707_v7  ;;  %1217 = vmatpush.bf16.msra.mxu1 %v1712_v5  ;;  %v1563_v51 = vld [vmem:[%s2965_s3 + $0x20] sm:$0xf] }
 0x192   :  { %v607_v34 = vrot.slane %v606_v0, 4  ;;  %v650_v50 = vadd.f32 %v649_v32, %v630_v2  ;;  %v497_v14 = vpop.f32.mrf.mxu2  ;;  %1186 = vmatpush.bf16.msra.mxu0 %v1616_v48  ;;  %v1595_v32 = vld [vmem:[%s2965_s3 + $0x60] sm:$0xf]  ;;  %v1849_v2 = vld [vmem:[%s2965_s3 + $0x64] sm:$0xf] }
 0x193   :  { %v526_v19 = vpop.f32.mrf.mxu3  ;;  %v1600_v30 = vor.u32 %v1849_v2, %v1597_v13  ;;  %1159 = vmatpush.bf16.msra.mxu3 %v1708_v4  ;;  %v1677_v48 = vld [vmem:[%s2965_s3 + $0x110] sm:$0xf0]  ;;  %v1547_v2 = vld [vmem:[%s2965_s3] sm:$0xf]  ;;  %v1839_v4 = vld [vmem:[%s2965_s3 + $0xc] sm:$0xf0] }
 0x194   :  { %v608_v33 = vadd.f32 %v607_v34, %v606_v0  ;;  %v651_v35 = vrot.slane %v650_v50, 4  ;;  %v2474_v36 = vadd.f32 %v526_v19, %v497_v14  ;;  %v1851_v0 = vld [vmem:[%s2965_s3 + $0x6c] sm:$0xf0]  ;;  %v1691_v34 = vld [vmem:[%s2965_s3 + $0x120] sm:$0xf] }
 0x195   :  { %v1596_v27 = vor.u32 %v1851_v0, %v1595_v32  ;;  %v1873_v14 = vld [vmem:[%s2965_s3 + $0x124] sm:$0xf]  ;;  %v1693_v19 = vld [vmem:[%s2965_s3 + $0x130] sm:$0xf0]  ;;  %v1564_v32 = vor.u32 %v1843_v54, %v1563_v51  ;;  %v1862_v54 = vld [vmem:[%s2965_s3 + $0xcc] sm:$0xf] }
 0x196   :  { %v609_v41 = vrot.slane %v608_v33, 2  ;;  %v652_v42 = vadd.f32 %v651_v35, %v650_v50  ;;  %v593_v45 = vadd.f32 %v592_v18, %v2474_v36  ;;  %v629_v46 = vmul.f32 %v2474_v36, %v2474_v36  ;;  %v1875_v50 = vld [vmem:[%s2965_s3 + $0x12c] sm:$0xf0]  ;;  %1187 = vmatpush.bf16.msra.mxu0 %v1600_v30  ;;  %v1565_v0 = vld [vmem:[%s2965_s3 + $0x30] sm:$0xf0] }
 0x197   :  { %1129 = vmatpush.bf16.msra.mxu2 %v1596_v27  ;;  %v1692_v23 = vor.u32 %v1875_v50, %v1691_v34  ;;  %v1548_v30 = vor.u32 %v1839_v4, %v1547_v2  ;;  %v1667_v50 = vld [vmem:[%s2965_s3 + $0xe8] sm:$0xf] }
 0x198   :  { %v610_v57 = vadd.f32 %v609_v41, %v608_v33  ;;  %v653_v60 = vrot.slane %v652_v42, 2  ;;  %v594_v39 = vrot.slane %v593_v45, 4  ;;  %v637_v63 = vadd.f32 %v636_v28, %v629_v46  ;;  %v1871_v41 = vld [vmem:[%s2965_s3 + $0x10c] sm:$0xf0] }
 0x199   :  { %v1696_v33 = vor.u32 %v1873_v14, %v1693_v19  ;;  %1160 = vmatpush.bf16.msra.mxu3 %v1692_v23  ;;  %v1868_v14 = vld [vmem:[%s2965_s3 + $0xf4] sm:$0xf0]  ;;  %v1866_v19 = vld [vmem:[%s2965_s3 + $0xec] sm:$0xf] }
 0x19a   :  { %v611_v6 = vrot.slane %v610_v57, 1  ;;  %v654_v8 = vadd.f32 %v653_v60, %v652_v42  ;;  %v595_v11 = vadd.f32 %v594_v39, %v593_v45  ;;  %v638_v12 = vrot.slane %v637_v63, 4  ;;  %v1869_v42 = vld [vmem:[%s2965_s3 + $0x104] sm:$0xf]  ;;  %1188 = vmatpush.bf16.msra.mxu0 %v1584_v29  ;;  %v1898_v23 = vld [vmem:[%s2965_s3 + $0x1ec] sm:$0xf] }
 0x19b   :  { %1218 = vmatpush.bf16.msra.mxu1 %v1696_v33  ;;  %1130 = vmatpush.bf16.msra.mxu2 %v1580_v25  ;;  %v1676_v60 = vor.u32 %v1871_v41, %v1675_v40  ;;  %v1680_v39 = vor.u32 %v1869_v42, %v1677_v48  ;;  %v1668_v22 = vor.u32 %v1868_v14, %v1667_v50  ;;  %v1797_v33 = vld [vmem:[%s2965_s3 + $0x1f8] sm:$0xf0]  ;;  %v1864_v25 = vld [vmem:[%s2965_s3 + $0xd4] sm:$0xf0]  ;;  %v1779_v29 = vld [vmem:[%s2965_s3 + $0x1c8] sm:$0xf] }
 0x19c   :  { %v612_v3 = vadd.f32 %v611_v6, %v610_v57  ;;  %v655_v10 = vrot.slane %v654_v8, 1  ;;  %v596_v16 = vrot.slane %v595_v11, 2  ;;  %v639_v18 = vadd.f32 %v638_v12, %v637_v63  ;;  %v1841_v57 = vld [vmem:[%s2965_s3 + $0x24] sm:$0xf]  ;;  %v1896_v41 = vld [vmem:[%s2965_s3 + $0x1d4] sm:$0xf0] }
 0x19d   :  { %v1568_v6 = vor.u32 %v1841_v57, %v1565_v0  ;;  %1161 = vmatpush.bf16.msra.mxu3 %v1676_v60  ;;  %v1652_v42 = vor.u32 %v1864_v25, %v1651_v38  ;;  %v1653_v57 = vld [vmem:[%s2965_s3 + $0xd8] sm:$0xf0]  ;;  %v1892_v14 = vld [vmem:[%s2965_s3 + $0x1b4] sm:$0xf0]  ;;  %v1747_v25 = vld [vmem:[%s2965_s3 + $0x188] sm:$0xf] }
 0x19e   :  { %v2539_v35 = vmul.f32 0.015625, %v612_v3  ;;  %v656_v24 = vadd.f32 %v655_v10, %v654_v8  ;;  %v597_v37 = vadd.f32 %v596_v16, %v595_v11  ;;  %v640_v28 = vrot.slane %v639_v18, 2  ;;  %v1837_v8 = vld [vmem:[%s2965_s3 + $0x4] sm:$0xf]  ;;  %v1549_v11 = vld [vmem:[%s2965_s3 + $0x10] sm:$0xf0] }
 0x19f   :  { %1219 = vmatpush.bf16.msra.mxu1 %v1680_v39  ;;  %1131 = vmatpush.bf16.msra.mxu2 %v1564_v32  ;;  %v1552_v34 = vor.u32 %v1837_v8, %v1549_v11  ;;  %v1795_v3 = vld [vmem:[%s2965_s3 + $0x1e8] sm:$0xf]  ;;  %v1656_v39 = vor.u32 %v1862_v54, %v1653_v57 }
 0x1a0   :  { %v658_v45 = vmul.f32 0.015625, %v656_v24  ;;  %v660_v46 = vmul.f32 %v2539_v35, %v2539_v35  ;;  %v678_v47 = vsub.f32 %v2429_v49, %v2539_v35  ;;  %v598_v62 = vrot.slane %v597_v37, 1  ;;  %1189 = vmatpush.bf16.msra.mxu0 %v1568_v6  ;;  %v1635_v11 = vld [vmem:[%s2965_s3 + $0xa8] sm:$0xf] }
 0x1a1   :  { %v641_v7 = vadd.f32 %v640_v28, %v639_v18  ;;  %v1900_v18 = vld [vmem:[%s2965_s3 + $0x1f4] sm:$0xf0]  ;;  %v1800_v28 = vor.u32 %v1898_v23, %v1797_v33  ;;  %v664_v8 = vsub.f32 %v2344_v55, %v2539_v35  ;;  %v1763_v55 = vld [vmem:[%s2965_s3 + $0x1a8] sm:$0xf] }
 0x1a2   :  { %v662_v63 = vsub.f32 %v658_v45, %v660_v46  ;;  %v599_v17 = vadd.f32 %v598_v62, %v597_v37  ;;  %v1796_v24 = vor.u32 %v1900_v18, %v1795_v3  ;;  %v1672_v37 = vor.u32 %v1866_v19, %v1669_v20  ;;  %v1858_v3 = vld [vmem:[%s2965_s3 + $0xac] sm:$0xf]  ;;  %v1765_v20 = vld [vmem:[%s2965_s3 + $0x1b8] sm:$0xf0] }
 0x1a3   :  { %v642_v5 = vrot.slane %v641_v7, 1  ;;  %1132 = vmatpush.bf16.msra.mxu2 %v1548_v30  ;;  %v1780_v45 = vor.u32 %v1896_v41, %v1779_v29  ;;  %1328 = vmatpush.bf16.msrb.mxu1 %v1800_v28  ;;  %v676_v62 = vsub.f32 %v2388_v52, %v2539_v35  ;;  %v1764_v18 = vor.u32 %v1892_v14, %v1763_v55  ;;  %v1890_v19 = vld [vmem:[%s2965_s3 + $0x1ac] sm:$0xf] }
 0x1a4   :  { %v680_v12 = vadd.f32 1e-05, %v662_v63  ;;  %v2584_v13 = vmul.f32 0.015625, %v599_v17  ;;  %1190 = vmatpush.bf16.msra.mxu0 %v1552_v34  ;;  %1270 = vmatpush.bf16.msrb.mxu3 %v1796_v24  ;;  %v1894_v63 = vld [vmem:[%s2965_s3 + $0x1cc] sm:$0xf]  ;;  %v666_v34 = vsub.f32 %v2342_v53, %v2539_v35  ;;  %v670_v53 = vsub.f32 %v2352_v59, %v2539_v35 }
 0x1a5   :  { %v643_v27 = vadd.f32 %v642_v5, %v641_v7  ;;  %v1781_v17 = vld [vmem:[%s2965_s3 + $0x1d8] sm:$0xf0]  ;;  %v1619_v24 = vld [vmem:[%s2965_s3 + $0x88] sm:$0xf]  ;;  %v1768_v38 = vor.u32 %v1890_v19, %v1765_v20  ;;  %v674_v29 = vsub.f32 %v2371_v9, %v2539_v35 }
 0x1a6   :  { %1909 = vrsqrt.f32 %v680_v12  ;;  %v659_v10 = vmul.f32 %v2584_v13, %v2584_v13  ;;  %v677_v16 = vsub.f32 %v2474_v36, %v2584_v13  ;;  %v675_v48 = vsub.f32 %v2420_v43, %v2584_v13  ;;  %v1882_v43 = vld [vmem:[%s2965_s3 + $0x16c] sm:$0xf] }
 0x1a7   :  { %v657_v21 = vmul.f32 0.015625, %v643_v27  ;;  %1241 = vmatpush.bf16.msrb.mxu2 %v1668_v22  ;;  %v1784_v32 = vor.u32 %v1894_v63, %v1781_v17  ;;  %vm697_vm8 = vweird.f32 %v680_v12  ;;  %v1860_v27 = vld [vmem:[%s2965_s3 + $0xb4] sm:$0xf0]  ;;  %v663_v59 = vsub.f32 %v2356_v61, %v2584_v13  ;;  %v1854_v17 = vld [vmem:[%s2965_s3 + $0x8c] sm:$0xf] }
 0x1a8   :  { %1299 = vmatpush.bf16.msrb.mxu0 %v1672_v37  ;;  %1271 = vmatpush.bf16.msrb.mxu3 %v1780_v45  ;;  %v1636_v50 = vor.u32 %v1860_v27, %v1635_v11  ;;  %v1856_v37 = vld [vmem:[%s2965_s3 + $0x94] sm:$0xf0]  ;;  %v665_v28 = vsub.f32 %v2350_v58, %v2584_v13  ;;  %v671_v49 = vsub.f32 %v2392_v15, %v2584_v13 }
 0x1a9   :  { %v661_v40 = vsub.f32 %v657_v21, %v659_v10  ;;  %1329 = vmatpush.bf16.msrb.mxu1 %v1784_v32  ;;  %v672_v21 = vsub.f32 %v2364_v1, %v2539_v35  ;;  %v1888_v61 = vld [vmem:[%s2965_s3 + $0x194] sm:$0xf0]  ;;  %v1620_v45 = vor.u32 %v1856_v37, %v1619_v24  ;;  %v1621_v32 = vld [vmem:[%s2965_s3 + $0x98] sm:$0xf0]  ;;  %v1587_v37 = vld [vmem:[%s2965_s3 + $0x48] sm:$0xf] }
 0x1aa   :  { %v1624_v52 = vor.u32 %v1854_v17, %v1621_v32  ;;  %v1699_v17 = vld [vmem:[%s2965_s3 + $0x128] sm:$0xf] }
 0x1ab   :  { %v2626_v46 = vadd.f32 1e-05, %v661_v40  ;;  %1242 = vmatpush.bf16.msrb.mxu2 %v1652_v42 }
 0x1ac   :  { %v1910_v7 = vpop.eup %1909  ;;  %1300 = vmatpush.bf16.msrb.mxu0 %v1656_v39  ;;  %1272 = vmatpush.bf16.msrb.mxu3 %v1764_v18  ;;  %v1852_v18 = vld [vmem:[%s2965_s3 + $0x74] sm:$0xf0] }
 0x1ad   :  { %v692_v51 = vmul.f32 %v1910_v7, %v680_v12  ;;  %1911 = vrsqrt.f32 %v2626_v46  ;;  %vm698_vm7 = vweird.f32 %v1910_v7  ;;  %v668_v12 = vsub.f32 %v2346_v56, %v2539_v35  ;;  %v1637_v56 = vld [vmem:[%s2965_s3 + $0xb8] sm:$0xf0]  ;;  %1330 = vmatpush.bf16.msrb.mxu1 %v1768_v38  ;;  %v1848_v38 = vld [vmem:[%s2965_s3 + $0x54] sm:$0xf0] }
 0x1ae   :  { %vm699_vm9 = vmor %vm697_vm8, %vm698_vm7  ;;  %v1640_v1 = vor.u32 %v1858_v3, %v1637_v56  ;;  %vm687_vm11 = vweird.f32 %v2626_v46  ;;  %v1731_v56 = vld [vmem:[%s2965_s3 + $0x168] sm:$0xf] }
 0x1af   :  { %v693_v60 = vmul.f32 %v1910_v7, %v692_v51  ;;  %1243 = vmatpush.bf16.msrb.mxu2 %v1636_v50 }
 0x1b0   :  { %1301 = vmatpush.bf16.msrb.mxu0 %v1640_v1 }
 0x1b1   :  { %v694_v0 = vmul.f32 0.5, %v693_v60 }
 0x1b3   :  { %v1912_v2 = vpop.eup %1911  ;;  %v695_v4 = vsub.f32 1.5, %v694_v0  ;;  %1244 = vmatpush.bf16.msrb.mxu2 %v1620_v45 }
 0x1b4   :  { %v682_v5 = vmul.f32 %v1912_v2, %v2626_v46  ;;  %vm688_vm10 = vweird.f32 %v1912_v2  ;;  %1302 = vmatpush.bf16.msrb.mxu0 %v1624_v52 }
 0x1b5   :  { %v696_v6 = vmul.f32 %v1910_v7, %v695_v4  ;;  %vm689_vm12 = vmor %vm687_vm11, %vm688_vm10 }
 0x1b6   :  { %v683_v30 = vmul.f32 %v1912_v2, %v682_v5  ;;  %v1886_v5 = vld [vmem:[%s2965_s3 + $0x18c] sm:$0xf] }
 0x1b7   :  { %v700_v10 = vsel %vm699_vm9, %v1910_v7, %v696_v6  ;;  %v1748_v7 = vor.u32 %v1888_v61, %v1747_v25  ;;  %v1749_v6 = vld [vmem:[%s2965_s3 + $0x198] sm:$0xf0]  ;;  %v1715_v25 = vld [vmem:[%s2965_s3 + $0x148] sm:$0xf]  ;;  %v1880_v61 = vld [vmem:[%s2965_s3 + $0x154] sm:$0xf0] }
 0x1b8   :  { %v684_v22 = vmul.f32 0.5, %v683_v30  ;;  %v702_v23 = vmul.f32 %v700_v10, %v664_v8  ;;  %v704_v33 = vmul.f32 %v700_v10, %v666_v34  ;;  %v716_v58 = vmul.f32 %v700_v10, %v678_v47 }
 0x1b9   :  { %v710_v57 = vmul.f32 %v700_v10, %v672_v21  ;;  %v712_v60 = vmul.f32 %v700_v10, %v674_v29  ;;  %v2704_v9 = vmul.f32 %v700_v10, %v668_v12  ;;  %1273 = vmatpush.bf16.msrb.mxu3 %v1748_v7  ;;  %v673_v47 = vsub.f32 %v2400_v31, %v2584_v13 }
 0x1ba   :  { %v685_v40 = vsub.f32 1.5, %v684_v22  ;;  %v718_v41 = vmax.f32 %v702_v23, 0.0  ;;  %v720_v42 = vmax.f32 %v704_v33, 0.0  ;;  %v714_v15 = vmul.f32 %v700_v10, %v676_v62  ;;  %v1884_v22 = vld [vmem:[%s2965_s3 + $0x174] sm:$0xf0] }
 0x1bb   :  { %v726_v39 = vmax.f32 %v710_v57, 0.0  ;;  %v728_v63 = vmax.f32 %v712_v60, 0.0  ;;  %v732_v31 = vmax.f32 %v716_v58, 0.0  ;;  %v708_v4 = vmul.f32 %v700_v10, %v670_v53  ;;  %v1603_v53 = vld [vmem:[%s2965_s3 + $0x68] sm:$0xf] }
 0x1bc   :  { %v686_v51 = vmul.f32 %v1912_v2, %v685_v40  ;;  %v2702_v54 = vpack.c.bf16 %v720_v42, %v718_v41  ;;  %v1752_v35 = vor.u32 %v1886_v5, %v1749_v6  ;;  %v730_v12 = vmax.f32 %v714_v15, 0.0  ;;  %v1850_v23 = vld [vmem:[%s2965_s3 + $0x6c] sm:$0xf]  ;;  %v1605_v33 = vld [vmem:[%s2965_s3 + $0x78] sm:$0xf0] }
 0x1bd   :  { %v2730_v11 = vpack.c.bf16 %v728_v63, %v726_v39  ;;  %v722_v55 = vmax.f32 %v2704_v9, 0.0  ;;  %v724_v14 = vmax.f32 %v708_v4, 0.0  ;;  %v1604_v21 = vor.u32 %v1852_v18, %v1603_v53  ;;  %v1571_v39 = vld [vmem:[%s2965_s3 + $0x28] sm:$0xf]  ;;  %v1844_v63 = vld [vmem:[%s2965_s3 + $0x34] sm:$0xf0] }
 0x1be   :  { %v690_v46 = vsel %vm689_vm12, %v1912_v2, %v686_v51  ;;  %1162 = vmatmul.bf16.vlgmr.msra.gmra.mxu3 %v2702_v54  ;;  %1220 = vmatmul.bf16.vlgmr.msra.gmra.mxu1 %v2702_v54  ;;  %v1608_v24 = vor.u32 %v1850_v23, %v1605_v33  ;;  %v669_v29 = vsub.f32 %v2377_v26, %v2584_v13  ;;  %v1846_v51 = vld [vmem:[%s2965_s3 + $0x4c] sm:$0xf]  ;;  %v1589_v26 = vld [vmem:[%s2965_s3 + $0x58] sm:$0xf0]  ;;  %v1876_v15 = vld [vmem:[%s2965_s3 + $0x134] sm:$0xf0] }
 0x1bf   :  { %v701_v0 = vmul.f32 %v690_v46, %v663_v59  ;;  %v703_v2 = vmul.f32 %v690_v46, %v665_v28  ;;  %v715_v8 = vmul.f32 %v690_v46, %v677_v16  ;;  %1331 = vmatpush.bf16.msrb.mxu1 %v1752_v35  ;;  %v709_v30 = vmul.f32 %v690_v46, %v671_v49  ;;  %v1717_v49 = vld [vmem:[%s2965_s3 + $0x158] sm:$0xf0]  ;;  %v1842_v5 = vld [vmem:[%s2965_s3 + $0x2c] sm:$0xf]  ;;  %v1872_v35 = vld [vmem:[%s2965_s3 + $0x114] sm:$0xf0] }
 0x1c0   :  { %v711_v34 = vmul.f32 %v690_v46, %v673_v47  ;;  %v2735_v16 = vpack.c.bf16 %v732_v31, %v730_v12  ;;  %v713_v19 = vmul.f32 %v690_v46, %v675_v48  ;;  %v1732_v59 = vor.u32 %v1884_v22, %v1731_v56  ;;  %v1733_v48 = vld [vmem:[%s2965_s3 + $0x178] sm:$0xf0]  ;;  %1245 = vmatpush.bf16.msrb.mxu2 %v1604_v21  ;;  %v1874_v31 = vld [vmem:[%s2965_s3 + $0x12c] sm:$0xf]  ;;  %v1555_v12 = vld [vmem:[%s2965_s3 + $0x8] sm:$0xf] }
 0x1c1   :  { %v717_v62 = vmax.f32 %v701_v0, 0.0  ;;  %v719_v27 = vmax.f32 %v703_v2, 0.0  ;;  %v731_v3 = vmax.f32 %v715_v8, 0.0  ;;  %v725_v10 = vmax.f32 %v709_v30, 0.0  ;;  %1303 = vmatpush.bf16.msrb.mxu0 %v1608_v24  ;;  %v1701_v0 = vld [vmem:[%s2965_s3 + $0x138] sm:$0xf0] }
 0x1c2   :  { %v727_v36 = vmax.f32 %v711_v34, 0.0  ;;  %v667_v28 = vsub.f32 %v2360_v44, %v2584_v13  ;;  %v1736_v1 = vor.u32 %v1882_v43, %v1733_v48  ;;  %1274 = vmatpush.bf16.msrb.mxu3 %v1732_v59  ;;  %v1588_v44 = vor.u32 %v1848_v38, %v1587_v37  ;;  %v1878_v13 = vld [vmem:[%s2965_s3 + $0x14c] sm:$0xf]  ;;  %v1573_v6 = vld [vmem:[%s2965_s3 + $0x38] sm:$0xf0] }
 0x1c3   :  { %v2732_v50 = vpack.c.bf16 %v719_v27, %v717_v62  ;;  %v1716_v40 = vor.u32 %v1880_v61, %v1715_v25  ;;  %v729_v41 = vmax.f32 %v713_v19, 0.0  ;;  %v707_v58 = vmul.f32 %v690_v46, %v669_v29  ;;  %v1683_v8 = vld [vmem:[%s2965_s3 + $0x108] sm:$0xf]  ;;  %v1870_v62 = vld [vmem:[%s2965_s3 + $0x10c] sm:$0xf] }
 0x1c4   :  { %v2751_v20 = vpack.c.bf16 %v727_v36, %v725_v10  ;;  %1332 = vmatpush.bf16.msrb.mxu1 %v1736_v1  ;;  %v705_v42 = vmul.f32 %v690_v46, %v667_v28  ;;  %v736_v7 = vpack.c.bf16 %v724_v14, %v722_v55  ;;  %1246 = vmatpush.bf16.msrb.mxu2 %v1588_v44  ;;  %v1685_v27 = vld [vmem:[%s2965_s3 + $0x118] sm:$0xf0]  ;;  %v1840_v55 = vld [vmem:[%s2965_s3 + $0x14] sm:$0xf0] }
 0x1c5   :  { %1133 = vmatmul.bf16.vlgmr.msra.gmra.mxu2 %v2732_v50  ;;  %1191 = vmatmul.bf16.vlgmr.msra.gmra.mxu0 %v2732_v50  ;;  %v2784_v45 = vpack.c.bf16 %v731_v3, %v729_v41  ;;  %v723_v60 = vmax.f32 %v707_v58, 0.0  ;;  %v1592_v9 = vor.u32 %v1846_v51, %v1589_v26  ;;  %v1720_v47 = vor.u32 %v1878_v13, %v1717_v49  ;;  %v1838_v3 = vld [vmem:[%s2965_s3 + $0xc] sm:$0xf]  ;;  %v1557_v10 = vld [vmem:[%s2965_s3 + $0x18] sm:$0xf0] }
 0x1c6   :  { %1275 = vmatpush.bf16.msrb.mxu3 %v1716_v40  ;;  %v721_v57 = vmax.f32 %v705_v42, 0.0  ;;  %v1572_v32 = vor.u32 %v1844_v63, %v1571_v39  ;;  %v1700_v2 = vor.u32 %v1876_v15, %v1699_v17  ;;  %v1704_v4 = vor.u32 %v1874_v31, %v1701_v0 }
 0x1c7   :  { %1304 = vmatpush.bf16.msrb.mxu0 %v1592_v9  ;;  %v1576_v52 = vor.u32 %v1842_v5, %v1573_v6  ;;  %v1684_v30 = vor.u32 %v1872_v35, %v1683_v8  ;;  %v1688_v34 = vor.u32 %v1870_v62, %v1685_v27  ;;  %v1556_v14 = vor.u32 %v1840_v55, %v1555_v12 }
 0x1c8   :  { %1333 = vmatpush.bf16.msrb.mxu1 %v1720_v47  ;;  %v735_v46 = vpack.c.bf16 %v723_v60, %v721_v57  ;;  %1247 = vmatpush.bf16.msrb.mxu2 %v1572_v32  ;;  %v1560_v36 = vor.u32 %v1838_v3, %v1557_v10 }
 0x1ca   :  { %1276 = vmatpush.bf16.msrb.mxu3 %v1700_v2 }
 0x1cb   :  { %1305 = vmatpush.bf16.msrb.mxu0 %v1576_v52 }
 0x1cc   :  { %1334 = vmatpush.bf16.msrb.mxu1 %v1704_v4  ;;  %1248 = vmatpush.bf16.msrb.mxu2 %v1556_v14 }
 0x1ce   :  { %1167 = vmatmul.bf16.gmra.mxu3 %v736_v7  ;;  %1225 = vmatmul.bf16.gmra.mxu1 %v736_v7 }
 0x1cf   :  { %1277 = vmatpush.bf16.msrb.mxu3 %v1684_v30  ;;  %1306 = vmatpush.bf16.msrb.mxu0 %v1560_v36 }
 0x1d0   :  { %1335 = vmatpush.bf16.msrb.mxu1 %v1688_v34 }
 0x1d5   :  { %1138 = vmatmul.bf16.gmra.mxu2 %v735_v46  ;;  %1196 = vmatmul.bf16.gmra.mxu0 %v735_v46 }
 0x1de   :  { %1172 = vmatmul.bf16.gmra.mxu3 %v2730_v11  ;;  %1230 = vmatmul.bf16.gmra.mxu1 %v2730_v11 }
 0x1e5   :  { %1143 = vmatmul.bf16.gmra.mxu2 %v2751_v20  ;;  %1201 = vmatmul.bf16.gmra.mxu0 %v2751_v20 }
 0x1ee   :  { %1177 = vmatmul.bf16.gmra.mxu3 %v2735_v16  ;;  %1235 = vmatmul.bf16.gmra.mxu1 %v2735_v16 }
 0x1f5   :  { %1148 = vmatmul.bf16.gmra.mxu2 %v2784_v45  ;;  %1206 = vmatmul.bf16.gmra.mxu0 %v2784_v45 }
 0x1fe   :  { %1278 = vmatmul.bf16.vlgmr.msrb.gmra.mxu3 %v2702_v54  ;;  %1336 = vmatmul.bf16.vlgmr.msrb.gmra.mxu1 %v2702_v54 }
 0x205   :  { %1249 = vmatmul.bf16.vlgmr.msrb.gmra.mxu2 %v2732_v50  ;;  %1307 = vmatmul.bf16.vlgmr.msrb.gmra.mxu0 %v2732_v50 }
 0x20e   :  { %1283 = vmatmul.bf16.gmra.mxu3 %v736_v7  ;;  %1341 = vmatmul.bf16.gmra.mxu1 %v736_v7 }
 0x215   :  { %1254 = vmatmul.bf16.gmra.mxu2 %v735_v46  ;;  %1312 = vmatmul.bf16.gmra.mxu0 %v735_v46 }
 0x21e   :  { %1288 = vmatmul.bf16.gmra.mxu3 %v2730_v11  ;;  %1346 = vmatmul.bf16.gmra.mxu1 %v2730_v11 }
 0x225   :  { %1259 = vmatmul.bf16.gmra.mxu2 %v2751_v20  ;;  %1317 = vmatmul.bf16.gmra.mxu0 %v2751_v20 }
 0x22e   :  { %1293 = vmatmul.bf16.gmra.mxu3 %v2735_v16  ;;  %1351 = vmatmul.bf16.gmra.mxu1 %v2735_v16 }
 0x235   :  { %1264 = vmatmul.bf16.gmra.mxu2 %v2784_v45  ;;  %1322 = vmatmul.bf16.gmra.mxu0 %v2784_v45 }
 0x23b   :  { %v1221_v54 = vpop.f32.mrf.mxu1 }
 0x241   :  { %v1163_v50 = vpop.f32.mrf.mxu3 }
 0x242   :  { %v1192_v53 = vpop.f32.mrf.mxu0 }
 0x243   :  { %v1222_v18 = vadd.f32 %v1221_v54, %v1192_v53  ;;  %v1223_v56 = vpop.f32.mrf.mxu1 }
 0x245   :  { %1358 = vst [vmem:[%s2966_s4 + $0x8] sm:$0xff] %v1222_v18 }
 0x248   :  { %v1134_v11 = vpop.f32.mrf.mxu2 }
 0x249   :  { %v1164_v19 = vadd.f32 %v1163_v50, %v1134_v11  ;;  %v1165_v20 = vpop.f32.mrf.mxu3 }
 0x24a   :  { %v1194_v21 = vpop.f32.mrf.mxu0 }
 0x24b   :  { %1357 = vst [vmem:[%s2966_s4] sm:$0xff] %v1164_v19  ;;  %v1224_v16 = vadd.f32 %v1223_v56, %v1194_v21  ;;  %v1226_v22 = vpop.f32.mrf.mxu1 }
 0x24d   :  { %1362 = vst [vmem:[%s2966_s4 + $0x28] sm:$0xff] %v1224_v16 }
 0x250   :  { %v1136_v23 = vpop.f32.mrf.mxu2 }
 0x251   :  { %v1166_v33 = vadd.f32 %v1165_v20, %v1136_v23  ;;  %v1168_v59 = vpop.f32.mrf.mxu3 }
 0x252   :  { %v1197_v24 = vpop.f32.mrf.mxu0 }
 0x253   :  { %1361 = vst [vmem:[%s2966_s4 + $0x20] sm:$0xff] %v1166_v33  ;;  %v1227_v43 = vadd.f32 %v1226_v22, %v1197_v24  ;;  %v1228_v48 = vpop.f32.mrf.mxu1 }
 0x255   :  { %1366 = vst [vmem:[%s2966_s4 + $0x48] sm:$0xff] %v1227_v43 }
 0x258   :  { %v1139_v37 = vpop.f32.mrf.mxu2 }
 0x259   :  { %v1169_v28 = vadd.f32 %v1168_v59, %v1139_v37  ;;  %v1170_v1 = vpop.f32.mrf.mxu3 }
 0x25a   :  { %v1199_v38 = vpop.f32.mrf.mxu0 }
 0x25b   :  { %1365 = vst [vmem:[%s2966_s4 + $0x40] sm:$0xff] %v1169_v28  ;;  %v1229_v25 = vadd.f32 %v1228_v48, %v1199_v38  ;;  %v1231_v61 = vpop.f32.mrf.mxu1 }
 0x25d   :  { %1370 = vst [vmem:[%s2966_s4 + $0x68] sm:$0xff] %v1229_v25 }
 0x260   :  { %v1141_v29 = vpop.f32.mrf.mxu2 }
 0x261   :  { %v1171_v44 = vadd.f32 %v1170_v1, %v1141_v29  ;;  %v1173_v40 = vpop.f32.mrf.mxu3 }
 0x262   :  { %v1202_v41 = vpop.f32.mrf.mxu0 }
 0x263   :  { %1369 = vst [vmem:[%s2966_s4 + $0x60] sm:$0xff] %v1171_v44  ;;  %v1232_v42 = vadd.f32 %v1231_v61, %v1202_v41  ;;  %v1233_v58 = vpop.f32.mrf.mxu1 }
 0x265   :  { %1374 = vst [vmem:[%s2966_s4 + $0x88] sm:$0xff] %v1232_v42 }
 0x268   :  { %v1144_v45 = vpop.f32.mrf.mxu2 }
 0x269   :  { %v1174_v7 = vadd.f32 %v1173_v40, %v1144_v45  ;;  %v1175_v51 = vpop.f32.mrf.mxu3 }
 0x26a   :  { %v1204_v26 = vpop.f32.mrf.mxu0 }
 0x26b   :  { %1373 = vst [vmem:[%s2966_s4 + $0x80] sm:$0xff] %v1174_v7  ;;  %v1234_v13 = vadd.f32 %v1233_v58, %v1204_v26  ;;  %v1236_v57 = vpop.f32.mrf.mxu1 }
 0x26d   :  { %1378 = vst [vmem:[%s2966_s4 + $0xa8] sm:$0xff] %v1234_v13 }
 0x270   :  { %v1146_v60 = vpop.f32.mrf.mxu2 }
 0x271   :  { %v1176_v9 = vadd.f32 %v1175_v51, %v1146_v60  ;;  %v1178_v49 = vpop.f32.mrf.mxu3 }
 0x272   :  { %v1207_v47 = vpop.f32.mrf.mxu0 }
 0x273   :  { %1377 = vst [vmem:[%s2966_s4 + $0xa0] sm:$0xff] %v1176_v9  ;;  %v1237_v46 = vadd.f32 %v1236_v57, %v1207_v47  ;;  %v1238_v39 = vpop.f32.mrf.mxu1 }
 0x275   :  { %1382 = vst [vmem:[%s2966_s4 + $0xc8] sm:$0xff] %v1237_v46 }
 0x278   :  { %v1149_v63 = vpop.f32.mrf.mxu2 }
 0x279   :  { %v1179_v17 = vadd.f32 %v1178_v49, %v1149_v63  ;;  %v1180_v32 = vpop.f32.mrf.mxu3 }
 0x27a   :  { %v1209_v15 = vpop.f32.mrf.mxu0 }
 0x27b   :  { %1381 = vst [vmem:[%s2966_s4 + $0xc0] sm:$0xff] %v1179_v17  ;;  %v1239_v31 = vadd.f32 %v1238_v39, %v1209_v15  ;;  %v1337_v0 = vpop.f32.mrf.mxu1 }
 0x27d   :  { %1386 = vst [vmem:[%s2966_s4 + $0xe8] sm:$0xff] %v1239_v31 }
 0x280   :  { %v1151_v2 = vpop.f32.mrf.mxu2 }
 0x281   :  { %v1181_v4 = vadd.f32 %v1180_v32, %v1151_v2  ;;  %v1279_v5 = vpop.f32.mrf.mxu3 }
 0x282   :  { %v1308_v6 = vpop.f32.mrf.mxu0 }
 0x283   :  { %1385 = vst [vmem:[%s2966_s4 + $0xe0] sm:$0xff] %v1181_v4  ;;  %v1338_v8 = vadd.f32 %v1337_v0, %v1308_v6  ;;  %v1339_v52 = vpop.f32.mrf.mxu1 }
 0x285   :  { %1360 = vst [vmem:[%s2966_s4 + $0x18] sm:$0xff] %v1338_v8 }
 0x288   :  { %v1250_v35 = vpop.f32.mrf.mxu2 }
 0x289   :  { %v1280_v62 = vadd.f32 %v1279_v5, %v1250_v35  ;;  %v1281_v27 = vpop.f32.mrf.mxu3 }
 0x28a   :  { %v1310_v30 = vpop.f32.mrf.mxu0 }
 0x28b   :  { %1359 = vst [vmem:[%s2966_s4 + $0x10] sm:$0xff] %v1280_v62  ;;  %v1340_v34 = vadd.f32 %v1339_v52, %v1310_v30  ;;  %v1342_v12 = vpop.f32.mrf.mxu1 }
 0x28d   :  { %1364 = vst [vmem:[%s2966_s4 + $0x38] sm:$0xff] %v1340_v34 }
 0x290   :  { %v1252_v55 = vpop.f32.mrf.mxu2 }
 0x291   :  { %v1282_v14 = vadd.f32 %v1281_v27, %v1252_v55  ;;  %v1284_v3 = vpop.f32.mrf.mxu3 }
 0x292   :  { %v1313_v10 = vpop.f32.mrf.mxu0 }
 0x293   :  { %1363 = vst [vmem:[%s2966_s4 + $0x30] sm:$0xff] %v1282_v14  ;;  %v1343_v36 = vadd.f32 %v1342_v12, %v1313_v10  ;;  %v1344_v54 = vpop.f32.mrf.mxu1 }
 0x295   :  { %1368 = vst [vmem:[%s2966_s4 + $0x58] sm:$0xff] %v1343_v36 }
 0x298   :  { %v1255_v50 = vpop.f32.mrf.mxu2 }
 0x299   :  { %v1285_v53 = vadd.f32 %v1284_v3, %v1255_v50  ;;  %v1286_v18 = vpop.f32.mrf.mxu3 }
 0x29a   :  { %v1315_v56 = vpop.f32.mrf.mxu0 }
 0x29b   :  { %1367 = vst [vmem:[%s2966_s4 + $0x50] sm:$0xff] %v1285_v53  ;;  %v1345_v11 = vadd.f32 %v1344_v54, %v1315_v56  ;;  %v1347_v19 = vpop.f32.mrf.mxu1 }
 0x29d   :  { %1372 = vst [vmem:[%s2966_s4 + $0x78] sm:$0xff] %v1345_v11 }
 0x2a0   :  { %v1257_v20 = vpop.f32.mrf.mxu2 }
 0x2a1   :  { %v1287_v21 = vadd.f32 %v1286_v18, %v1257_v20  ;;  %v1289_v16 = vpop.f32.mrf.mxu3 }
 0x2a2   :  { %v1318_v22 = vpop.f32.mrf.mxu0 }
 0x2a3   :  { %1371 = vst [vmem:[%s2966_s4 + $0x70] sm:$0xff] %v1287_v21  ;;  %v1348_v23 = vadd.f32 %v1347_v19, %v1318_v22  ;;  %v1349_v33 = vpop.f32.mrf.mxu1 }
 0x2a5   :  { %1376 = vst [vmem:[%s2966_s4 + $0x98] sm:$0xff] %v1348_v23 }
 0x2a8   :  { %v1260_v59 = vpop.f32.mrf.mxu2 }
 0x2a9   :  { %v1290_v24 = vadd.f32 %v1289_v16, %v1260_v59  ;;  %v1291_v37 = vpop.f32.mrf.mxu3 }
 0x2aa   :  { %v1320_v43 = vpop.f32.mrf.mxu0 }
 0x2ab   :  { %1375 = vst [vmem:[%s2966_s4 + $0x90] sm:$0xff] %v1290_v24  ;;  %v1350_v48 = vadd.f32 %v1349_v33, %v1320_v43  ;;  %v1352_v28 = vpop.f32.mrf.mxu1 }
 0x2ad   :  { %1380 = vst [vmem:[%s2966_s4 + $0xb8] sm:$0xff] %v1350_v48 }
 0x2b0   :  { %v1262_v1 = vpop.f32.mrf.mxu2 }
 0x2b1   :  { %v1292_v38 = vadd.f32 %v1291_v37, %v1262_v1  ;;  %v1294_v29 = vpop.f32.mrf.mxu3 }
 0x2b2   :  { %v1323_v25 = vpop.f32.mrf.mxu0 }
 0x2b3   :  { %1379 = vst [vmem:[%s2966_s4 + $0xb0] sm:$0xff] %v1292_v38  ;;  %v1353_v61 = vadd.f32 %v1352_v28, %v1323_v25  ;;  %v1354_v41 = vpop.f32.mrf.mxu1 }
 0x2b5   :  { %1384 = vst [vmem:[%s2966_s4 + $0xd8] sm:$0xff] %v1353_v61 }
 0x2b8   :  { %v1265_v44 = vpop.f32.mrf.mxu2 }
 0x2b9   :  { %v1295_v40 = vadd.f32 %v1294_v29, %v1265_v44  ;;  %v1296_v45 = vpop.f32.mrf.mxu3 }
 0x2ba   :  { %v1325_v42 = vpop.f32.mrf.mxu0 }
 0x2bb   :  { %1383 = vst [vmem:[%s2966_s4 + $0xd0] sm:$0xff] %v1295_v40  ;;  %v1355_v58 = vadd.f32 %v1354_v41, %v1325_v42 }
 0x2bd   :  { %1388 = vst [vmem:[%s2966_s4 + $0xf8] sm:$0xff] %v1355_v58 }
 0x2c0   :  { %v1267_v7 = vpop.f32.mrf.mxu2 }
 0x2c1   :  { %v1297_v51 = vadd.f32 %v1296_v45, %v1267_v7 }
 0x2c3   :  { %1387 = vst [vmem:[%s2966_s4 + $0xf0] sm:$0xff] %v1297_v51 }

</bundles_post_ra>
